<compile_context>
chip_gen: v7x
topology: tpu7x:2x2x1
jax: 0.10.0
libtpu: 0.0.40
codegen_flags: <defaults>
</compile_context>

<pallas_src>
import functools

import jax
import jax.numpy as jnp
from jax import lax
from jax.experimental import pallas as pl
from jax.experimental.pallas import tpu as pltpu

_LANE = 128


def _round_up(x, m):
    return ((x + m - 1) // m) * m


def _conv_bn_relu_kernel(x_ref, w_ref, scale_ref, bias_ref, o_ref, cols_ref,
                         *, kh_size, kw_size, cin_p):
    """One (batch, H-tile) grid step.

    x_ref:     (TH + KH - 1, W_out + KW - 1, Cin_p)  padded input rows (with halo)
    w_ref:     (KH * KW * Cin_p, Cout_p)             im2col weight matrix
    scale_ref: (1, Cout_p)                           gamma / sqrt(var + eps)
    bias_ref:  (1, Cout_p)                           beta - mean * scale
    o_ref:     (TH, W_out, Cout_p)
    cols_ref:  (TH, W_out, KH * KW * Cin_p)          VMEM im2col scratch
    """
    th, w_out, _ = o_ref.shape

    # im2col: copy each (kh, kw) tap of the input window into its 128-aligned
    # lane slot of the scratch buffer (ref slices; no big live values).
    for kh in range(kh_size):
        for kw in range(kw_size):
            c0 = (kh * kw_size + kw) * cin_p
            cols_ref[:, :, c0:c0 + cin_p] = x_ref[kh:kh + th, kw:kw + w_out, :]

    # Single MXU contraction with K = KH*KW*Cin_p.
    acc = lax.dot_general(
        cols_ref[...], w_ref[...],
        dimension_numbers=(((2,), (0,)), ((), ())),
        preferred_element_type=jnp.float32)          # (TH, W_out, Cout_p)

    # Folded BatchNorm (per-channel affine) + ReLU.
    y = acc * scale_ref[...] + bias_ref[...]
    o_ref[...] = jnp.maximum(y, 0.0).astype(o_ref.dtype)


def conv2d_norm_activation(x_nchw, weight_oihw, gamma, beta, running_mean,
                           running_var, *, stride=1, padding=1, eps=1e-5,
                           tile_h=8):
    """Forward pass of Conv2dNormActivation (conv bias=False, eval-mode BN, ReLU).

    x_nchw:      (N, Cin, H, W)     float32
    weight_oihw: (Cout, Cin, KH, KW)
    returns:     (N, Cout, H_out, W_out) float32 (NCHW, matching PyTorch)
    """
    N, Cin, H, W = x_nchw.shape
    Cout, cin_w, KH, KW = weight_oihw.shape
    assert cin_w == Cin
    assert stride == 1, "only stride=1 is implemented"

    H_out = H + 2 * padding - KH + 1
    W_out = W + 2 * padding - KW + 1
    Wp = W_out + KW - 1                       # = W + 2*padding

    Cin_p = _round_up(Cin, _LANE)
    Cout_p = _round_up(Cout, _LANE)

    TH = min(tile_h, H_out)
    nH = -(-H_out // TH)                      # ceil-div
    H_out_p = nH * TH

    # ---- layout glue (fuses into one XLA pass under jit): NCHW->NHWC,
    # channel pad to 128 lanes, spatial zero-pad, overlapping H-row tiles ----
    x_nhwc = jnp.transpose(x_nchw, (0, 2, 3, 1)).astype(jnp.float32)
    bottom_pad = (H_out_p + KH - 1) - (H + padding)
    x_pad = jnp.pad(x_nhwc, ((0, 0), (padding, bottom_pad),
                             (padding, padding), (0, Cin_p - Cin)))
    row_idx = (jnp.arange(nH)[:, None] * TH
               + jnp.arange(TH + KH - 1)[None, :])          # (nH, TH+KH-1)
    x_tiles = x_pad[:, row_idx]               # (N, nH, TH+KH-1, Wp, Cin_p)

    # Weight: OIHW -> HWIO, pad channels, flatten to the im2col matrix.
    w_hwio = jnp.transpose(weight_oihw, (2, 3, 1, 0)).astype(jnp.float32)
    w_hwio = jnp.pad(w_hwio, ((0, 0), (0, 0),
                              (0, Cin_p - Cin), (0, Cout_p - Cout)))
    w2d = w_hwio.reshape(KH * KW * Cin_p, Cout_p)

    # Fold BatchNorm running stats into a per-channel affine.
    scale = gamma / jnp.sqrt(running_var + eps)
    bias = beta - running_mean * scale
    scale2d = jnp.pad(scale, (0, Cout_p - Cout)).reshape(1, Cout_p).astype(jnp.float32)
    bias2d = jnp.pad(bias, (0, Cout_p - Cout)).reshape(1, Cout_p).astype(jnp.float32)

    kernel = functools.partial(_conv_bn_relu_kernel, kh_size=KH, kw_size=KW,
                               cin_p=Cin_p)

    out = pl.pallas_call(
        kernel,
        out_shape=jax.ShapeDtypeStruct((N, H_out_p, W_out, Cout_p), jnp.float32),
        grid_spec=pltpu.PrefetchScalarGridSpec(
            num_scalar_prefetch=0,
            grid=(N, nH),
            in_specs=[
                pl.BlockSpec((None, None, TH + KH - 1, Wp, Cin_p),
                             lambda n, i: (n, i, 0, 0, 0)),
                pl.BlockSpec((KH * KW * Cin_p, Cout_p), lambda n, i: (0, 0)),
                pl.BlockSpec((1, Cout_p), lambda n, i: (0, 0)),
                pl.BlockSpec((1, Cout_p), lambda n, i: (0, 0)),
            ],
            out_specs=pl.BlockSpec((None, TH, W_out, Cout_p),
                                   lambda n, i: (n, i, 0, 0)),
            scratch_shapes=[
                pltpu.VMEM((TH, W_out, KH * KW * Cin_p), jnp.float32),
            ],
        ),
        compiler_params=pltpu.CompilerParams(
            dimension_semantics=("parallel", "parallel"),
            vmem_limit_bytes=64 * 1024 * 1024),
    )(x_tiles, w2d, scale2d, bias2d)

    # Drop channel / row padding; module boundary is NCHW like PyTorch.
    out = out[:, :H_out, :, :Cout]
    return jnp.transpose(out, (0, 3, 1, 2))


def _reference(x_nchw, weight_oihw, gamma, beta, running_mean, running_var,
               padding=1, eps=1e-5):
    """Pure-JAX reference (conv + eval-mode BN + ReLU)."""
    y = lax.conv_general_dilated(
        x_nchw, weight_oihw,
        window_strides=(1, 1), padding=((padding, padding), (padding, padding)),
        dimension_numbers=("NCHW", "OIHW", "NCHW"))
    scale = gamma / jnp.sqrt(running_var + eps)
    bias = beta - running_mean * scale
    y = y * scale[None, :, None, None] + bias[None, :, None, None]
    return jnp.maximum(y, 0.0)


if __name__ == "__main__":
    key = jax.random.PRNGKey(0)
    k_x, k_w, k_g, k_b, k_m, k_v = jax.random.split(key, 6)

    N, Cin, H, W = 2, 4, 16, 16
    Cout = 8

    x = jax.random.normal(k_x, (N, Cin, H, W), dtype=jnp.float32)
    weight = 0.1 * jax.random.normal(k_w, (Cout, Cin, 3, 3), dtype=jnp.float32)
    gamma = 1.0 + 0.1 * jax.random.normal(k_g, (Cout,), dtype=jnp.float32)
    beta = 0.1 * jax.random.normal(k_b, (Cout,), dtype=jnp.float32)
    running_mean = 0.1 * jax.random.normal(k_m, (Cout,), dtype=jnp.float32)
    running_var = jnp.abs(jax.random.normal(k_v, (Cout,), dtype=jnp.float32)) + 0.5

    fused = jax.jit(conv2d_norm_activation)
    out = jax.block_until_ready(
        fused(x, weight, gamma, beta, running_mean, running_var))

    ref = _reference(x, weight, gamma, beta, running_mean, running_var)
    assert out.shape == (N, Cout, H, W), out.shape
    if not jnp.allclose(out, ref, atol=1e-4, rtol=1e-4):
        max_err = jnp.max(jnp.abs(out - ref))
        raise AssertionError(
            f"Pallas kernel output does not match reference (max err {max_err})")

    print("KERNEL_OK")
</pallas_src>

<mosaic_0001>
module attributes {stable_mosaic.version = 11 : i64} {
  func.func @_conv_bn_relu_kernel(%arg0: i32, %arg1: i32, %arg2: memref<1x1x10x18x128xf32, #tpu.memory_space<vmem>>, %arg3: memref<1152x128xf32, #tpu.memory_space<vmem>>, %arg4: memref<1x128xf32, #tpu.memory_space<vmem>>, %arg5: memref<1x128xf32, #tpu.memory_space<vmem>>, %arg6: memref<1x8x16x128xf32, #tpu.memory_space<vmem>>, %arg7: memref<8x16x1152xf32, #tpu.memory_space<vmem>>) attributes {dimension_semantics = [#tpu.dimension_semantics<parallel>, #tpu.dimension_semantics<parallel>], iteration_bounds = array<i64: 2, 2>, scalar_prefetch = 0 : i64, scratch_operands = 1 : i64, tpu.core_type = #tpu.core_type<tc>, window_params = [{transform_indices = @transform_0, window_bounds = array<i64: 1, 1, 10, 18, 128>}, {pipeline_mode = #tpu.pipeline_mode<synchronous>, transform_indices = @transform_1, window_bounds = array<i64: 1152, 128>}, {pipeline_mode = #tpu.pipeline_mode<synchronous>, transform_indices = @transform_2, window_bounds = array<i64: 1, 128>}, {pipeline_mode = #tpu.pipeline_mode<synchronous>, transform_indices = @transform_3, window_bounds = array<i64: 1, 128>}, {transform_indices = @transform_4, window_bounds = array<i64: 1, 8, 16, 128>}]} {
    %c0 = arith.constant 0 : index
    %c0_0 = arith.constant 0 : index
    %c0_1 = arith.constant 0 : index
    %c0_2 = arith.constant 0 : index
    %c0_3 = arith.constant 0 : index
    %0 = vector.load %arg2[%c0, %c0_0, %c0_1, %c0_2, %c0_3] : memref<1x1x10x18x128xf32, #tpu.memory_space<vmem>>, vector<1x1x8x16x128xf32>
    %1 = vector.shape_cast %0 : vector<1x1x8x16x128xf32> to vector<8x16x128xf32>
    %c0_4 = arith.constant 0 : index
    %c0_5 = arith.constant 0 : index
    %c0_6 = arith.constant 0 : index
    %2 = vector.load %arg7[%c0_4, %c0_5, %c0_6] : memref<8x16x1152xf32, #tpu.memory_space<vmem>>, vector<8x16x128xf32>
    tpu.vector_store %arg7[%c0_4, %c0_5, %c0_6], %1 {strides = array<i32>} : memref<8x16x1152xf32, #tpu.memory_space<vmem>>, vector<8x16x128xf32>,
    %c0_7 = arith.constant 0 : index
    %c0_8 = arith.constant 0 : index
    %c0_9 = arith.constant 0 : index
    %c1 = arith.constant 1 : index
    %c0_10 = arith.constant 0 : index
    %3 = vector.load %arg2[%c0_7, %c0_8, %c0_9, %c1, %c0_10] : memref<1x1x10x18x128xf32, #tpu.memory_space<vmem>>, vector<1x1x8x16x128xf32>
    %4 = vector.shape_cast %3 : vector<1x1x8x16x128xf32> to vector<8x16x128xf32>
    %c0_11 = arith.constant 0 : index
    %c0_12 = arith.constant 0 : index
    %c128 = arith.constant 128 : index
    %5 = vector.load %arg7[%c0_11, %c0_12, %c128] : memref<8x16x1152xf32, #tpu.memory_space<vmem>>, vector<8x16x128xf32>
    tpu.vector_store %arg7[%c0_11, %c0_12, %c128], %4 {strides = array<i32>} : memref<8x16x1152xf32, #tpu.memory_space<vmem>>, vector<8x16x128xf32>,
    %c0_13 = arith.constant 0 : index
    %c0_14 = arith.constant 0 : index
    %c0_15 = arith.constant 0 : index
    %c2 = arith.constant 2 : index
    %c0_16 = arith.constant 0 : index
    %6 = vector.load %arg2[%c0_13, %c0_14, %c0_15, %c2, %c0_16] : memref<1x1x10x18x128xf32, #tpu.memory_space<vmem>>, vector<1x1x8x16x128xf32>
    %7 = vector.shape_cast %6 : vector<1x1x8x16x128xf32> to vector<8x16x128xf32>
    %c0_17 = arith.constant 0 : index
    %c0_18 = arith.constant 0 : index
    %c256 = arith.constant 256 : index
    %8 = vector.load %arg7[%c0_17, %c0_18, %c256] : memref<8x16x1152xf32, #tpu.memory_space<vmem>>, vector<8x16x128xf32>
    tpu.vector_store %arg7[%c0_17, %c0_18, %c256], %7 {strides = array<i32>} : memref<8x16x1152xf32, #tpu.memory_space<vmem>>, vector<8x16x128xf32>,
    %c0_19 = arith.constant 0 : index
    %c0_20 = arith.constant 0 : index
    %c1_21 = arith.constant 1 : index
    %c0_22 = arith.constant 0 : index
    %c0_23 = arith.constant 0 : index
    %9 = vector.load %arg2[%c0_19, %c0_20, %c1_21, %c0_22, %c0_23] : memref<1x1x10x18x128xf32, #tpu.memory_space<vmem>>, vector<1x1x8x16x128xf32>
    %10 = vector.shape_cast %9 : vector<1x1x8x16x128xf32> to vector<8x16x128xf32>
    %c0_24 = arith.constant 0 : index
    %c0_25 = arith.constant 0 : index
    %c384 = arith.constant 384 : index
    %11 = vector.load %arg7[%c0_24, %c0_25, %c384] : memref<8x16x1152xf32, #tpu.memory_space<vmem>>, vector<8x16x128xf32>
    tpu.vector_store %arg7[%c0_24, %c0_25, %c384], %10 {strides = array<i32>} : memref<8x16x1152xf32, #tpu.memory_space<vmem>>, vector<8x16x128xf32>,
    %c0_26 = arith.constant 0 : index
    %c0_27 = arith.constant 0 : index
    %c1_28 = arith.constant 1 : index
    %c1_29 = arith.constant 1 : index
    %c0_30 = arith.constant 0 : index
    %12 = vector.load %arg2[%c0_26, %c0_27, %c1_28, %c1_29, %c0_30] : memref<1x1x10x18x128xf32, #tpu.memory_space<vmem>>, vector<1x1x8x16x128xf32>
    %13 = vector.shape_cast %12 : vector<1x1x8x16x128xf32> to vector<8x16x128xf32>
    %c0_31 = arith.constant 0 : index
    %c0_32 = arith.constant 0 : index
    %c512 = arith.constant 512 : index
    %14 = vector.load %arg7[%c0_31, %c0_32, %c512] : memref<8x16x1152xf32, #tpu.memory_space<vmem>>, vector<8x16x128xf32>
    tpu.vector_store %arg7[%c0_31, %c0_32, %c512], %13 {strides = array<i32>} : memref<8x16x1152xf32, #tpu.memory_space<vmem>>, vector<8x16x128xf32>,
    %c0_33 = arith.constant 0 : index
    %c0_34 = arith.constant 0 : index
    %c1_35 = arith.constant 1 : index
    %c2_36 = arith.constant 2 : index
    %c0_37 = arith.constant 0 : index
    %15 = vector.load %arg2[%c0_33, %c0_34, %c1_35, %c2_36, %c0_37] : memref<1x1x10x18x128xf32, #tpu.memory_space<vmem>>, vector<1x1x8x16x128xf32>
    %16 = vector.shape_cast %15 : vector<1x1x8x16x128xf32> to vector<8x16x128xf32>
    %c0_38 = arith.constant 0 : index
    %c0_39 = arith.constant 0 : index
    %c640 = arith.constant 640 : index
    %17 = vector.load %arg7[%c0_38, %c0_39, %c640] : memref<8x16x1152xf32, #tpu.memory_space<vmem>>, vector<8x16x128xf32>
    tpu.vector_store %arg7[%c0_38, %c0_39, %c640], %16 {strides = array<i32>} : memref<8x16x1152xf32, #tpu.memory_space<vmem>>, vector<8x16x128xf32>,
    %c0_40 = arith.constant 0 : index
    %c0_41 = arith.constant 0 : index
    %c2_42 = arith.constant 2 : index
    %c0_43 = arith.constant 0 : index
    %c0_44 = arith.constant 0 : index
    %18 = vector.load %arg2[%c0_40, %c0_41, %c2_42, %c0_43, %c0_44] : memref<1x1x10x18x128xf32, #tpu.memory_space<vmem>>, vector<1x1x8x16x128xf32>
    %19 = vector.shape_cast %18 : vector<1x1x8x16x128xf32> to vector<8x16x128xf32>
    %c0_45 = arith.constant 0 : index
    %c0_46 = arith.constant 0 : index
    %c768 = arith.constant 768 : index
    %20 = vector.load %arg7[%c0_45, %c0_46, %c768] : memref<8x16x1152xf32, #tpu.memory_space<vmem>>, vector<8x16x128xf32>
    tpu.vector_store %arg7[%c0_45, %c0_46, %c768], %19 {strides = array<i32>} : memref<8x16x1152xf32, #tpu.memory_space<vmem>>, vector<8x16x128xf32>,
    %c0_47 = arith.constant 0 : index
    %c0_48 = arith.constant 0 : index
    %c2_49 = arith.constant 2 : index
    %c1_50 = arith.constant 1 : index
    %c0_51 = arith.constant 0 : index
    %21 = vector.load %arg2[%c0_47, %c0_48, %c2_49, %c1_50, %c0_51] : memref<1x1x10x18x128xf32, #tpu.memory_space<vmem>>, vector<1x1x8x16x128xf32>
    %22 = vector.shape_cast %21 : vector<1x1x8x16x128xf32> to vector<8x16x128xf32>
    %c0_52 = arith.constant 0 : index
    %c0_53 = arith.constant 0 : index
    %c896 = arith.constant 896 : index
    %23 = vector.load %arg7[%c0_52, %c0_53, %c896] : memref<8x16x1152xf32, #tpu.memory_space<vmem>>, vector<8x16x128xf32>
    tpu.vector_store %arg7[%c0_52, %c0_53, %c896], %22 {strides = array<i32>} : memref<8x16x1152xf32, #tpu.memory_space<vmem>>, vector<8x16x128xf32>,
    %c0_54 = arith.constant 0 : index
    %c0_55 = arith.constant 0 : index
    %c2_56 = arith.constant 2 : index
    %c2_57 = arith.constant 2 : index
    %c0_58 = arith.constant 0 : index
    %24 = vector.load %arg2[%c0_54, %c0_55, %c2_56, %c2_57, %c0_58] : memref<1x1x10x18x128xf32, #tpu.memory_space<vmem>>, vector<1x1x8x16x128xf32>
    %25 = vector.shape_cast %24 : vector<1x1x8x16x128xf32> to vector<8x16x128xf32>
    %c0_59 = arith.constant 0 : index
    %c0_60 = arith.constant 0 : index
    %c1024 = arith.constant 1024 : index
    %26 = vector.load %arg7[%c0_59, %c0_60, %c1024] : memref<8x16x1152xf32, #tpu.memory_space<vmem>>, vector<8x16x128xf32>
    tpu.vector_store %arg7[%c0_59, %c0_60, %c1024], %25 {strides = array<i32>} : memref<8x16x1152xf32, #tpu.memory_space<vmem>>, vector<8x16x128xf32>,
    %c0_61 = arith.constant 0 : index
    %c0_62 = arith.constant 0 : index
    %c0_63 = arith.constant 0 : index
    %27 = vector.load %arg7[%c0_61, %c0_62, %c0_63] : memref<8x16x1152xf32, #tpu.memory_space<vmem>>, vector<8x16x1152xf32>
    %c0_64 = arith.constant 0 : index
    %c0_65 = arith.constant 0 : index
    %28 = vector.load %arg3[%c0_64, %c0_65] : memref<1152x128xf32, #tpu.memory_space<vmem>>, vector<1152x128xf32>
    %cst = arith.constant dense<0.000000e+00> : vector<8x16x128xf32>
    %29 = tpu.matmul %27, %28, %cst {dimension_numbers = #tpu.dot_dimension_numbers<[2], [0], [0, 1], [1], [0, 0, 0, 1, 1, 1], [], []>} : vector<8x16x1152xf32>, vector<1152x128xf32>, vector<8x16x128xf32> -> vector<8x16x128xf32>
    %c0_66 = arith.constant 0 : index
    %c0_67 = arith.constant 0 : index
    %30 = vector.load %arg4[%c0_66, %c0_67] : memref<1x128xf32, #tpu.memory_space<vmem>>, vector<1x128xf32>
    %31 = vector.shape_cast %30 : vector<1x128xf32> to vector<1x1x128xf32>
    %32 = vector.broadcast %31 : vector<1x1x128xf32> to vector<8x16x128xf32>
    %33 = arith.mulf %29, %32 : vector<8x16x128xf32>
    %c0_68 = arith.constant 0 : index
    %c0_69 = arith.constant 0 : index
    %34 = vector.load %arg5[%c0_68, %c0_69] : memref<1x128xf32, #tpu.memory_space<vmem>>, vector<1x128xf32>
    %35 = vector.shape_cast %34 : vector<1x128xf32> to vector<1x1x128xf32>
    %36 = vector.broadcast %35 : vector<1x1x128xf32> to vector<8x16x128xf32>
    %37 = arith.addf %33, %36 : vector<8x16x128xf32>
    %cst_70 = arith.constant 0.000000e+00 : f32
    %38 = vector.broadcast %cst_70 : f32 to vector<8x16x128xf32>
    %39 = arith.maximumf %37, %38 : vector<8x16x128xf32>
    %c0_71 = arith.constant 0 : index
    %c0_72 = arith.constant 0 : index
    %c0_73 = arith.constant 0 : index
    %c0_74 = arith.constant 0 : index
    %40 = vector.load %arg6[%c0_71, %c0_72, %c0_73, %c0_74] : memref<1x8x16x128xf32, #tpu.memory_space<vmem>>, vector<1x8x16x128xf32>
    %41 = vector.shape_cast %40 : vector<1x8x16x128xf32> to vector<8x16x128xf32>
    %42 = vector.shape_cast %39 : vector<8x16x128xf32> to vector<1x8x16x128xf32>
    tpu.vector_store %arg6[%c0_71, %c0_72, %c0_73, %c0_74], %42 {strides = array<i32>} : memref<1x8x16x128xf32, #tpu.memory_space<vmem>>, vector<1x8x16x128xf32>,
    return
  }
  func.func @transform_0(%arg0: i32, %arg1: i32) -> (i32, i32, i32, i32, i32) {
    %c0_i32 = arith.constant 0 : i32
    %c0_i32_0 = arith.constant 0 : i32
    %c0_i32_1 = arith.constant 0 : i32
    %c0_i32_2 = arith.constant 0 : i32
    return %arg0, %arg1, %c0_i32, %c0_i32_0, %c0_i32_1 : i32, i32, i32, i32, i32
  }
  func.func @transform_1(%arg0: i32, %arg1: i32) -> (i32, i32) {
    %c0_i32 = arith.constant 0 : i32
    %c0_i32_0 = arith.constant 0 : i32
    %c0_i32_1 = arith.constant 0 : i32
    return %c0_i32, %c0_i32_0 : i32, i32
  }
  func.func @transform_2(%arg0: i32, %arg1: i32) -> (i32, i32) {
    %c0_i32 = arith.constant 0 : i32
    %c0_i32_0 = arith.constant 0 : i32
    %c0_i32_1 = arith.constant 0 : i32
    return %c0_i32, %c0_i32_0 : i32, i32
  }
  func.func @transform_3(%arg0: i32, %arg1: i32) -> (i32, i32) {
    %c0_i32 = arith.constant 0 : i32
    %c0_i32_0 = arith.constant 0 : i32
    %c0_i32_1 = arith.constant 0 : i32
    return %c0_i32, %c0_i32_0 : i32, i32
  }
  func.func @transform_4(%arg0: i32, %arg1: i32) -> (i32, i32, i32, i32) {
    %c0_i32 = arith.constant 0 : i32
    %c0_i32_0 = arith.constant 0 : i32
    %c0_i32_1 = arith.constant 0 : i32
    return %arg0, %arg1, %c0_i32, %c0_i32_0 : i32, i32, i32, i32
  }
}

</mosaic_0001>

<bundles_post_ra>
// kernel: conv2d_norm_activation.1
= control target key start
LH: loop header
LB: loop body
LE: loop exit
PB: predicated region body
PF: predicated region fallthrough
CT: control target
= control target key end

     0   :  { %s3598_s0 = inlined_call_operand.hbm [shape: f32[2,2,10,18,128], index: 0, kind: input, shape index: {}]   ;;  %s3599_s1 = inlined_call_operand.hbm [shape: f32[1152,128], index: 1, kind: input, shape index: {}]   ;;  %s3600_s2 = inlined_call_operand.hbm [shape: f32[1,128], index: 2, kind: input, shape index: {}]   ;;  %s3601_s3 = inlined_call_operand.hbm [shape: f32[1,128], index: 3, kind: input, shape index: {}]   ;;  %s3602_s4 = inlined_call_operand.hbm [shape: f32[2,16,16,128], index: 4, kind: output, shape index: {}]  }
   0x1   :  { %3612 = sst [smem:[#allocation18_spill]] %s3599_s1 }
   0x2   :  { %3613 = sst [smem:[#allocation19_spill]] %s3600_s2 }
   0x3   :  { %3614 = sst [smem:[#allocation20_spill]] %s3602_s4 }
   0x4   :  { %9 = vsyncpa [#allocation4], 0 }
   0x5   :  { %11 = vsyncpa [#allocation4 + $0x1], 0 }
   0x6   :  { %12 = vsyncpa [#allocation7], 0 }
   0x7   :  { %13 = vsyncpa [#allocation10], 0 }
   0x8   :  { %14 = vsyncpa [#allocation5], 0 }
   0x9   :  { %16 = vsyncpa [#allocation5 + $0x1], 0  ;;  %s2868_s15 = smov 0   ;;  %s2870_s16 = smov 0  }
   0xa   :  { %s2872_s17 = smov 0   ;;  %s2874_s18 = smov 0  }
   0xb   :  { %s2876_s19 = smov 0   ;;  %s2878_s20 = smov 0  }
   0xc   :  { %s2880_s21 = smov 0   ;;  %s2882_s22 = smov 0  }
   0xd LB: > { %3615 = sst [smem:[#allocation16_spill]] %s2804_s15  ;;  %s1792_s23 = sadd.s32 4294967295, %s2832_s22   ;;  %s2832_s22 = sphi %s2882_s22, %s22_s22   ;;  %s2828_s21 = sphi %s2880_s21, %s3644_s21   ;;  %s2824_s20 = sphi %s2878_s20, %s3643_s20   ;;  %s2820_s19 = sphi %s2876_s19, %s3642_s19   ;;  %s2816_s18 = sphi %s2874_s18, %s3641_s18   ;;  %s2812_s17 = sphi %s2872_s17, %s3640_s17   ;;  %s2808_s16 = sphi %s2870_s16, %s3639_s16   ;;  %s2804_s15 = sphi %s2868_s15, %s3638_s15  }
   0xe   : > { %s1793_s24 = sadd.s32 4294967294, %s2832_s22   ;;  %p56_p0 = scmp.ne.s32.totalorder %s2808_s16, %s2804_s15 }
   0xf   : > { %p2912_p1 = scmp.eq.s32.totalorder %s1792_s23, 0  ;;  %p2916_p2 = scmp.eq.s32.totalorder %s1792_s23, 3 }
  0x10   : > { %p151_p3 = scmp.eq.s32.totalorder %s1793_s24, 3  ;;  %p1794_p5 = scmp.ge.s32.totalorder %s2832_s22, 1 }
  0x11   : > { %s3616_s25 = scalar_select %p2912_p1, 1, 0 }
  0x12   : > { %s3617_s26 = scalar_select %p2916_p2, 1, 0 }
  0x13   : > { %p2922_p4 = por %p2912_p1, %p56_p0  ;;  %p2927_p6 = por %p151_p3, %p56_p0 }
  0x14   : > { %p158_p7 = scmp.lt.s32.totalorder %s2832_s22, 5  ;;  %s2834_s30 = smov [#allocation6]  }
  0x15   : > { %s3618_s27 = scalar_select %p2922_p4, 1, 0 }
  0x16   : > { %s3619_s28 = scalar_select %p2927_p6, 1, 0 }
  0x17   : > { %p2932_p8 = pnand %p1794_p5, %p158_p7  ;;  %s170_s5 = sshll.u32 %s2834_s30, 4  ;;  %s2936_s5 = int_to_ptr.vmem [resolvable:$true] %s170_s5 }
  0x18   : > { %3620 = sst [smem:[#allocation17_spill]] %s3619_s28  ;;  %s2835_s7 = smov [#allocation8]  }
  0x19   : > { %s3621_s29 = scalar_select %p2932_p8, 1, 0 }
  0x1a   : > { %p2515_p9 = pneg %p2932_p8  ;;  %s184_s8 = sshll.u32 %s2835_s7, 4  ;;  %s2946_s8 = int_to_ptr.vmem [resolvable:$true] %s184_s8 }
  0x1b   : > { %s2836_s9 = smov [#allocation9]   ;;  %s3623_s1 = sld [smem:[#allocation18_spill]] }
  0x1c   : > { %p2942_p10 = pnand %p2515_p9, %p2912_p1  ;;  %s2948_s10 = sshll.u32 %s2836_s9, 4  ;;  %s196_s10 = int_to_ptr.vmem [resolvable:$true] %s2948_s10 }
  0x1e   : > { %p2958_p12 = pneg %p2942_p10 }
  0x21   : > { %s2612_s13 = scalar_lea.hbm %s3623_s1, 18432 }
  0x22   : > { %p2613_p11 = scmp.ne.s32.totalorder %s3623_s1, %s2612_s13  ;;  %p2619_p3 = scmp.lt.u32.totalorder %s2612_s13, %s3623_s1 }
  0x24   : > { %p2615_p13 = pnand %p2958_p12, %p2613_p11 }
  0x26   : > { %p2616_p0 = pneg %p2615_p13 }
  0x28   : > { %p2621_p5 = pnand %p2619_p3, %p2616_p0 }
  0x2a   : > { %2624 = shalt.err (!%p2621_p5)
}
  0x2b   : > { %s2625_s9 = scalar_lea.vmem %s2936_s5, 18432  ;;  %p2633_p1 = scmp.lt.s32.totalorder %s2936_s5, %s2936_s5 }
  0x2c   : > { %p2626_p7 = scmp.ne.s32.totalorder %s2936_s5, %s2625_s9  ;;  %p2634_p4 = scmp.lt.s32.totalorder %s2625_s9, %s2625_s9 }
  0x2e   : > { %p2628_p9 = pnand %p2626_p7, %p2958_p12  ;;  %p2635_p11 = por %p2634_p4, %p2633_p1 }
  0x30   : > { %p2629_p6 = pneg %p2628_p9 }
  0x32   : > { %p2636_p13 = pnand %p2635_p11, %p2629_p6 }
  0x34   : > { %2639 = shalt.err (!%p2636_p13)
}
  0x35   : > { %s3610_s11 = smov 128   ;;  %s3611_s12 = smov 8  }
  0x36   : > { %2518 = dma.hbm_to_vmem [thread:$0]  (!%p2942_p10), %s3623_s1, 18432, %s2936_s5, [#allocation7], %s3610_s11, %s3610_s11, %s3611_s12  }
  0x37   : > { %s3625_s2 = sld [smem:[#allocation19_spill]] }
  0x3d   : > { %s2640_s7 = scalar_lea.hbm %s3625_s2, 16 }
  0x3e   : > { %p2641_p1 = scmp.ne.s32.totalorder %s3625_s2, %s2640_s7  ;;  %p2647_p0 = scmp.lt.u32.totalorder %s2640_s7, %s3625_s2 }
  0x40   : > { %p2643_p4 = pnand %p2641_p1, %p2958_p12 }
  0x42   : > { %p2644_p6 = pneg %p2643_p4 }
  0x44   : > { %p2649_p3 = pnand %p2647_p0, %p2644_p6 }
  0x46   : > { %2652 = shalt.err (!%p2649_p3)
}
  0x47   : > { %s2653_s5 = scalar_lea.vmem %s2946_s8, 16  ;;  %s2660_s28 = scalar_lea.vmem %s2946_s8, 32 }
  0x48   : > { %p2654_p5 = scmp.ne.s32.totalorder %s2946_s8, %s2653_s5  ;;  %p2661_p11 = scmp.lt.s32.totalorder %s2946_s8, %s2946_s8 }
  0x49   : > { %p2662_p13 = scmp.lt.s32.totalorder %s2660_s28, %s2653_s5 }
  0x4a   : > { %p2656_p7 = pnand %p2654_p5, %p2958_p12 }
  0x4b   : > { %p2663_p1 = por %p2662_p13, %p2661_p11 }
  0x4c   : > { %p2657_p9 = pneg %p2656_p7 }
  0x4e   : > { %p2664_p4 = pnand %p2663_p1, %p2657_p9 }
  0x50   : > { %2667 = shalt.err (!%p2664_p4)
}
  0x51   : > { %2521 = dma.hbm_to_vmem [thread:$0]  (!%p2942_p10), %s3625_s2, 16, %s2946_s8, [#allocation7]  }
  0x52   : > { %s2668_s23 = scalar_lea.hbm %s3601_s3, 16 }
  0x53   : > { %p2669_p6 = scmp.ne.s32.totalorder %s3601_s3, %s2668_s23  ;;  %p2675_p5 = scmp.lt.u32.totalorder %s2668_s23, %s3601_s3 }
  0x55   : > { %p2671_p0 = pnand %p2669_p6, %p2958_p12 }
  0x57   : > { %p2672_p3 = pneg %p2671_p0 }
  0x59   : > { %p2677_p7 = pnand %p2675_p5, %p2672_p3 }
  0x5b   : > { %2680 = shalt.err (!%p2677_p7)
}
  0x5c   : > { %s2681_s28 = scalar_lea.vmem %s196_s10, 16  ;;  %s2688_s8 = scalar_lea.vmem %s196_s10, 32 }
  0x5d   : > { %p2682_p9 = scmp.ne.s32.totalorder %s196_s10, %s2681_s28  ;;  %p2689_p1 = scmp.lt.s32.totalorder %s196_s10, %s196_s10 }
  0x5e   : > { %p2690_p4 = scmp.lt.s32.totalorder %s2688_s8, %s2681_s28 }
  0x5f   : > { %p2684_p11 = pnand %p2682_p9, %p2958_p12 }
  0x60   : > { %p2691_p8 = por %p2690_p4, %p2689_p1 }
  0x61   : > { %p2685_p13 = pneg %p2684_p11 }
  0x63   : > { %p2692_p2 = pnand %p2691_p8, %p2685_p13 }
  0x65   : > { %2695 = shalt.err (!%p2692_p2)
}
  0x66   : > { %2524 = dma.hbm_to_vmem [thread:$0]  (!%p2942_p10), %s3601_s3, 16, %s196_s10, [#allocation10]  }
  0x67   : > { %s31_s24 = sadd.s32 1, %s2824_s20  ;;  %s34_s6 = sadd.s32 1, %s2828_s21 }
  0x68   : > { %p32_p2 = scmp.ge.s32.totalorder %s31_s24, 2  ;;  %s43_s13 = sadd.s32 1, %s2812_s17 }
  0x69   : > { %p50_p8 = scmp.ne.s32.totalorder %s2812_s17, %s2808_s16  ;;  %p51_p12 = scmp.eq.s32.totalorder %s2832_s22, 0 }
  0x6a   : > { %s3646_s24 = smov (%p32_p2, %s31_s24), 0  ;;  %s3648_s6 = smov (!%p32_p2, %s34_s6), %s2828_s21 }
  0x6b   : > { %s39_s14 = ssub.s32 %s2824_s20, %s3646_s24  ;;  %p36_p6 = scmp.ge.s32.totalorder %s3648_s6, 2 }
  0x6c   : > { %p3626_p0 = scmp.ne.s32.totalorder %s3617_s26, 0  ;;  %p52_p10 = por %p51_p12, %p50_p8 }
  0x6d   : > { %p2536_p5 = scmp.lt.s32.totalorder %s2832_s22, 4  ;;  %s3650_s6 = smov (%p36_p6, %s3648_s6), 0 }
  0x6e   : > { %p3038_p3 = por %p3626_p0, %p50_p8  ;;  %s206_s10 = sand.u32 1, %s2812_s17  }
  0x6f   : > { %s2496_s30 = smul.u32 30, %s2824_s20  ;;  %s38_s7 = ssub.s32 %s2828_s21, %s3650_s6 }
  0x70   : > { %s40_s9 = sor.u32 %s39_s14, %s38_s7  ;;  %s2495_s5 = smul.u32 240, %s206_s10 }
  0x71   : > { %p41_p7 = scmp.eq.s32.totalorder %s40_s9, 0  ;;  %s2497_s28 = smul.u32 60, %s2828_s21 }
  0x72   : > { %p3050_p9 = pnand %p2536_p5, %p52_p10  ;;  %s210_s15 = scalar_lea.vmem [#allocation3], %s2495_s5 }
  0x73   : > { %s3055_s26 = scalar_select %p41_p7, %s2812_s17, %s43_s13  }
  0x74   : > { %s216_s4 = sadd.s32 %s2497_s28, %s2496_s30  ;;  %s219_s11 = sshll.u32 %s210_s15, 4  ;;  %s3057_s11 = int_to_ptr.vmem [resolvable:$true] %s219_s11 }
  0x75   : > { %s1799_s12 = sshll.u32 %s216_s4, 7  ;;  %s3064_s7 = scalar_lea.sflag [#allocation4], %s206_s10 }
  0x76   : > { %s3062_s14 = scalar_lea.hbm %s3598_s0, %s1799_s12  ;;  %p2698_p13 = pneg %p3050_p9 }
  0x77   : > { %s2696_s9 = scalar_lea.hbm %s3062_s14, 3840  ;;  %s2701_s1 = scalar_lea.hbm %s3598_s0, 15360 }
  0x78   : > { %p2697_p11 = scmp.ne.s32.totalorder %s3062_s14, %s2696_s9  ;;  %p2702_p2 = scmp.lt.u32.totalorder %s3062_s14, %s3598_s0 }
  0x79   : > { %p2703_p8 = scmp.lt.u32.totalorder %s2701_s1, %s2696_s9  ;;  %p2705_p6 = scmp.lt.u32.totalorder %s2696_s9, %s3062_s14 }
  0x7a   : > { %p2699_p1 = pnand %p2698_p13, %p2697_p11 }
  0x7b   : > { %p2704_p12 = por %p2703_p8, %p2702_p2 }
  0x7c   : > { %p2700_p4 = pneg %p2699_p1 }
  0x7d   : > { %p2706_p0 = por %p2705_p6, %p2704_p12 }
  0x7f   : > { %p2707_p10 = pnand %p2706_p0, %p2700_p4 }
  0x81   : > { %2710 = shalt.err (!%p2707_p10)
}
  0x82   : > { %s2711_s10 = scalar_lea.vmem %s3057_s11, 3840  ;;  %s2839_s5 = smov [#allocation3]  }
  0x83   : > { %p2712_p5 = scmp.ne.s32.totalorder %s3057_s11, %s2711_s10  ;;  %s2716_s28 = sshll.u32 %s2839_s5, 4  ;;  %s2717_s28 = int_to_ptr.vmem [resolvable:$false] %s2716_s28 }
  0x84   : > { %s2718_s4 = scalar_lea.vmem %s2717_s28, 7680  ;;  %p2719_p1 = scmp.lt.s32.totalorder %s3057_s11, %s2717_s28 }
  0x85   : > { %p2714_p7 = pnand %p2712_p5, %p2698_p13  ;;  %p2720_p2 = scmp.lt.s32.totalorder %s2718_s4, %s2711_s10 }
  0x87   : > { %p2715_p11 = pneg %p2714_p7  ;;  %p2721_p8 = por %p2720_p2, %p2719_p1 }
  0x89   : > { %p2722_p12 = pnand %p2721_p8, %p2715_p11 }
  0x8b   : > { %2725 = shalt.err (!%p2722_p12)
}
  0x8c   : > { %s3629_s15 = smov 8   ;;  %s3630_s9 = smov 128  }
  0x8d   : > { %2528 = dma.hbm_to_vmem [thread:$0]  (!%p3050_p9), %s3062_s14, 3840, %s3057_s11, %s3064_s7, %s3630_s9, %s3630_s9, %s3629_s15  }
  0x8e   : > { %p3631_p13 = scmp.ne.s32.totalorder %s3621_s29, 0 }
  0x8f   : > { %s3098_s13 = sand.u32 (!%p3631_p13), 1, %s2808_s16   ;;  %p3632_p4 = scmp.ne.s32.totalorder (!%p3631_p13), %s3618_s27, 0 }
  0x90   : > { %231 = sbr.rel (%p3631_p13) target bundleno = 571 (0x23b), region = 36  ;;  %s234_s1 = scalar_lea.sflag (!%p3631_p13), [#allocation4], %s3098_s13 }
  0x91   : > { %s2498_s30 = smul.u32 (!%p3631_p13), 240, %s3098_s13 }
  0x93   : > { %s3102_s2 = scalar_lea.vmem (!%p3631_p13), [#allocation3], %s2498_s30 }
  0x97   : > { %2787 = dma.done.wait (%p3632_p4), %s234_s1, 3840  }
  0x98   : > { %2789 = vsyncadd (%p3632_p4), %s234_s1, 4294963456  ;;  %p3633_p9 = scmp.ne.s32.totalorder %s3616_s25, 0 }
  0x9a   : > { %2791 = dma.done.wait (%p3633_p9), [#allocation7], 18448  }
  0x9b   : > { %2793 = vsyncadd (%p3633_p9), [#allocation7], 4294948848 }
  0x9c   : > { %2795 = dma.done.wait (%p3633_p9), [#allocation10], 16  }
  0x9d   : > { %2797 = vsyncadd (%p3633_p9), [#allocation10], 4294967280  ;;  %v725_v0 = vld [vmem:[#allocation6 + $0x80] sm:$0xff]  ;;  %v726_v1 = vld [vmem:[#allocation6 + $0x88] sm:$0xff]  ;;  %s1804_s25 = sshll.u32 %s3098_s13, 7  ;;  %s1910_s29 = sshll.u32 %s2816_s18, 4 }
  0x9e   : > { %v757_v2 = vld [vmem:[#allocation6 + $0x180] sm:$0xff]  ;;  %v2319_v3 = vpack.c.bf16 %v726_v1, %v725_v0  ;;  %v758_v4 = vld [vmem:[#allocation6 + $0x188] sm:$0xff]  ;;  %v727_v11 = vld [vmem:[#allocation6 + $0x90] sm:$0xff]  ;;  %s3490_s27 = scalar_lea.vmem [#allocation11], %s1804_s25  ;;  %s1906_s11 = sshll.u32 %s2820_s19, 5 }
  0x9f   : > { %v709_v5 = vld [vmem:[#allocation6] sm:$0xff]  ;;  %v710_v6 = vld [vmem:[#allocation6 + $0x8] sm:$0xff]  ;;  %v2351_v7 = vpack.c.bf16 %v758_v4, %v757_v2  ;;  %v728_v13 = vld [vmem:[#allocation6 + $0x98] sm:$0xff]  ;;  %s1670_s18 = sadd.s32 %s1910_s29, %s1906_s11  ;;  %s1673_s8 = sshll.u32 %s3490_s27, 4  ;;  %s3540_s8 = int_to_ptr.vmem [resolvable:$true] %s1673_s8 }
  0xa0   : > { %v2321_v8 = vpack.c.bf16 %v710_v6, %v709_v5  ;;  %v741_v9 = vld [vmem:[#allocation6 + $0x100] sm:$0xff]  ;;  %v742_v10 = vld [vmem:[#allocation6 + $0x108] sm:$0xff]  ;;  %2320 = vmatprep.subr.bf16.mxu0 %v2319_v3  ;;  %v759_v14 = vld [vmem:[#allocation6 + $0x190] sm:$0xff]  ;;  %v2323_v16 = vpack.c.bf16 %v728_v13, %v727_v11  ;;  %s1907_s19 = sshll.u32 %s1670_s18, 7  ;;  %s3634_s12 = sld [smem:[#allocation20_spill]] }
  0xa1   : > { %v2353_v12 = vpack.c.bf16 %v742_v10, %v741_v9  ;;  %v760_v15 = vld [vmem:[#allocation6 + $0x198] sm:$0xff]  ;;  %2352 = vmatprep.subr.bf16.mxu1 %v2351_v7  ;;  %v711_v18 = vld [vmem:[#allocation6 + $0x10] sm:$0xff]  ;;  %v729_v23 = vld [vmem:[#allocation6 + $0xa0] sm:$0xff]  ;;  %s1657_s5 = scalar_lea.sflag [#allocation5], %s3098_s13  ;;  %s2726_s28 = scalar_lea.vmem %s3540_s8, 2048 }
  0xa2   : > { %2322 = vmatpush3.bf16.msra.mxu0 %v2321_v8  ;;  %v2355_v17 = vpack.c.bf16 %v760_v15, %v759_v14  ;;  %v712_v19 = vld [vmem:[#allocation6 + $0x18] sm:$0xff]  ;;  %v743_v20 = vld [vmem:[#allocation6 + $0x110] sm:$0xff]  ;;  %v730_v24 = vld [vmem:[#allocation6 + $0xa8] sm:$0xff]  ;;  %p2727_p6 = scmp.ne.s32.totalorder %s3540_s8, %s2726_s28  ;;  %s2840_s4 = smov [#allocation11]  }
  0xa3   : > { %2354 = vmatpush3.bf16.msra.mxu1 %v2353_v12  ;;  %v2325_v21 = vpack.c.bf16 %v712_v19, %v711_v18  ;;  %v744_v22 = vld [vmem:[#allocation6 + $0x118] sm:$0xff]  ;;  %2324 = vmatprep.subr.bf16.mxu0 %v2323_v16  ;;  %v2327_v26 = vpack.c.bf16 %v730_v24, %v729_v23  ;;  %v761_v27 = vld [vmem:[#allocation6 + $0x1a0] sm:$0xff]  ;;  %v762_v28 = vld [vmem:[#allocation6 + $0x1a8] sm:$0xff]  ;;  %s2730_s15 = sshll.u32 %s2840_s4, 4  ;;  %s2731_s15 = int_to_ptr.vmem [resolvable:$false] %s2730_s15 }
  0xa4   : > { %2356 = vmatprep.subr.bf16.mxu1 %v2355_v17  ;;  %v2357_v25 = vpack.c.bf16 %v744_v22, %v743_v20  ;;  %v713_v29 = vld [vmem:[#allocation6 + $0x20] sm:$0xff]  ;;  %v2359_v30 = vpack.c.bf16 %v762_v28, %v761_v27  ;;  %v714_v31 = vld [vmem:[#allocation6 + $0x28] sm:$0xff]  ;;  %v731_v35 = vld [vmem:[#allocation6 + $0xb0] sm:$0xff]  ;;  %p2728_p0 = pnand %p2727_p6, %p3038_p3  ;;  %s2732_s9 = scalar_lea.vmem %s2731_s15, 4096 }
  0xa5   : > { %v745_v32 = vld [vmem:[#allocation6 + $0x120] sm:$0xff]  ;;  %v746_v33 = vld [vmem:[#allocation6 + $0x128] sm:$0xff]  ;;  %v2329_v34 = vpack.c.bf16 %v714_v31, %v713_v29  ;;  %v732_v36 = vld [vmem:[#allocation6 + $0xb8] sm:$0xff]  ;;  %p2733_p5 = scmp.lt.s32.totalorder %s3540_s8, %s2731_s15  ;;  %p2734_p7 = scmp.lt.s32.totalorder %s2732_s9, %s2726_s28 }
  0xa6   : > { %2326 = vmatpush3.bf16.msra.mxu0 %v2325_v21  ;;  %v763_v37 = vld [vmem:[#allocation6 + $0x1b0] sm:$0xff]  ;;  %v2361_v38 = vpack.c.bf16 %v746_v33, %v745_v32  ;;  %v2331_v39 = vpack.c.bf16 %v732_v36, %v731_v35  ;;  %v764_v40 = vld [vmem:[#allocation6 + $0x1b8] sm:$0xff]  ;;  %v733_v46 = vld [vmem:[#allocation6 + $0xc0] sm:$0xff]  ;;  %s3538_s10 = scalar_lea.hbm %s3634_s12, %s1907_s19  ;;  %p2729_p10 = pneg %p2728_p0 }
  0xa7   : > { %2358 = vmatpush3.bf16.msra.mxu1 %v2357_v25  ;;  %2328 = vmatprep.subr.bf16.mxu0 %v2327_v26  ;;  %v715_v41 = vld [vmem:[#allocation6 + $0x30] sm:$0xff]  ;;  %v716_v42 = vld [vmem:[#allocation6 + $0x38] sm:$0xff]  ;;  %v2363_v43 = vpack.c.bf16 %v764_v40, %v763_v37  ;;  %v734_v47 = vld [vmem:[#allocation6 + $0xc8] sm:$0xff]  ;;  %p2735_p11 = por %p2734_p7, %p2733_p5 }
  0xa8   : > { %2360 = vmatprep.subr.bf16.mxu1 %v2359_v30  ;;  %v747_v44 = vld [vmem:[#allocation6 + $0x130] sm:$0xff]  ;;  %v748_v45 = vld [vmem:[#allocation6 + $0x138] sm:$0xff]  ;;  %v765_v48 = vld [vmem:[#allocation6 + $0x1c0] sm:$0xff]  ;;  %v2333_v50 = vpack.c.bf16 %v716_v42, %v715_v41  ;;  %v2335_v52 = vpack.c.bf16 %v734_v47, %v733_v46 }
  0xa9   : > { %v766_v49 = vld [vmem:[#allocation6 + $0x1c8] sm:$0xff]  ;;  %v2365_v51 = vpack.c.bf16 %v748_v45, %v747_v44  ;;  %v717_v53 = vld [vmem:[#allocation6 + $0x40] sm:$0xff]  ;;  %v735_v58 = vld [vmem:[#allocation6 + $0xd0] sm:$0xff]  ;;  %p2736_p1 = pnand %p2735_p11, %p2729_p10 }
  0xaa   : > { %2330 = vmatpush3.bf16.msra.mxu0 %v2329_v34  ;;  %v718_v54 = vld [vmem:[#allocation6 + $0x48] sm:$0xff]  ;;  %v749_v55 = vld [vmem:[#allocation6 + $0x140] sm:$0xff]  ;;  %v2367_v56 = vpack.c.bf16 %v766_v49, %v765_v48  ;;  %v736_v59 = vld [vmem:[#allocation6 + $0xd8] sm:$0xff] }
  0xab   : > { %2362 = vmatpush3.bf16.msra.mxu1 %v2361_v38  ;;  %2332 = vmatprep.subr.bf16.mxu0 %v2331_v39  ;;  %v750_v57 = vld [vmem:[#allocation6 + $0x148] sm:$0xff]  ;;  %v767_v60 = vld [vmem:[#allocation6 + $0x1d0] sm:$0xff]  ;;  %v768_v61 = vld [vmem:[#allocation6 + $0x1d8] sm:$0xff]  ;;  %v2337_v62 = vpack.c.bf16 %v718_v54, %v717_v53  ;;  %v2339_v0 = vpack.c.bf16 %v736_v59, %v735_v58 }
  0xac   : > { %2364 = vmatprep.subr.bf16.mxu1 %v2363_v43  ;;  %v2369_v63 = vpack.c.bf16 %v750_v57, %v749_v55  ;;  %v719_v1 = vld [vmem:[#allocation6 + $0x50] sm:$0xff]  ;;  %v720_v2 = vld [vmem:[#allocation6 + $0x58] sm:$0xff]  ;;  %v2371_v4 = vpack.c.bf16 %v768_v61, %v767_v60  ;;  %v737_v6 = vld [vmem:[#allocation6 + $0xe0] sm:$0xff] }
  0xad   : > { %v751_v3 = vld [vmem:[#allocation6 + $0x150] sm:$0xff]  ;;  %v752_v5 = vld [vmem:[#allocation6 + $0x158] sm:$0xff]  ;;  %v738_v7 = vld [vmem:[#allocation6 + $0xe8] sm:$0xff]  ;;  %v2341_v10 = vpack.c.bf16 %v720_v2, %v719_v1 }
  0xae   : > { %2334 = vmatpush3.bf16.msra.mxu0 %v2333_v50  ;;  %v769_v8 = vld [vmem:[#allocation6 + $0x1e0] sm:$0xff]  ;;  %v770_v9 = vld [vmem:[#allocation6 + $0x1e8] sm:$0xff]  ;;  %v2373_v13 = vpack.c.bf16 %v752_v5, %v751_v3  ;;  %v2343_v14 = vpack.c.bf16 %v738_v7, %v737_v6  ;;  %v739_v20 = vld [vmem:[#allocation6 + $0xf0] sm:$0xff] }
  0xaf   : > { %2366 = vmatpush3.bf16.msra.mxu1 %v2365_v51  ;;  %2336 = vmatprep.subr.bf16.mxu0 %v2335_v52  ;;  %v721_v11 = vld [vmem:[#allocation6 + $0x60] sm:$0xff]  ;;  %v722_v12 = vld [vmem:[#allocation6 + $0x68] sm:$0xff]  ;;  %v2375_v18 = vpack.c.bf16 %v770_v9, %v769_v8  ;;  %v740_v21 = vld [vmem:[#allocation6 + $0xf8] sm:$0xff] }
  0xb0   : > { %2368 = vmatprep.subr.bf16.mxu1 %v2367_v56  ;;  %v753_v15 = vld [vmem:[#allocation6 + $0x160] sm:$0xff]  ;;  %v3118_v17 = vld [vmem:[%s3102_s2 + $0x18] sm:$0xff]  ;;  %v771_v22 = vld [vmem:[#allocation6 + $0x1f0] sm:$0xff]  ;;  %v2345_v24 = vpack.c.bf16 %v722_v12, %v721_v11  ;;  %v2347_v26 = vpack.c.bf16 %v740_v21, %v739_v20 }
  0xb1   : > { %v307_v16 = vld [vmem:[%s3102_s2 + $0x1] sm:$0xff]  ;;  %1062 = vmatprep.mubr.f32.mxu1 %v3118_v17  ;;  %v308_v52 = vld [vmem:[%s3102_s2 + $0x9] sm:$0xff]  ;;  %v3130_v2 = vld [vmem:[%s3102_s2 + $0x19] sm:$0xff] }
  0xb2   : > { %2338 = vmatpush3.bf16.msra.mxu0 %v2337_v62  ;;  %v754_v19 = vld [vmem:[#allocation6 + $0x168] sm:$0xff]  ;;  %917 = vmatprep.mubr.f32.mxu0 %v307_v16  ;;  %v772_v23 = vld [vmem:[#allocation6 + $0x1f8] sm:$0xff]  ;;  %v723_v27 = vld [vmem:[#allocation6 + $0x70] sm:$0xff] }
  0xb3   : > { %2370 = vmatpush3.bf16.msra.mxu1 %v2369_v63  ;;  %2340 = vmatprep.subr.bf16.mxu0 %v2339_v0  ;;  %v2377_v25 = vpack.c.bf16 %v754_v19, %v753_v15  ;;  %v724_v28 = vld [vmem:[#allocation6 + $0x78] sm:$0xff]  ;;  %v755_v29 = vld [vmem:[#allocation6 + $0x170] sm:$0xff]  ;;  %v2379_v30 = vpack.c.bf16 %v772_v23, %v771_v22  ;;  %v789_v32 = vld [vmem:[#allocation6 + $0x280] sm:$0xff] }
  0xb4   : > { %2372 = vmatprep.subr.bf16.mxu1 %v2371_v4  ;;  %v756_v31 = vld [vmem:[#allocation6 + $0x178] sm:$0xff]  ;;  %v790_v33 = vld [vmem:[#allocation6 + $0x288] sm:$0xff]  ;;  %v821_v34 = vld [vmem:[#allocation6 + $0x380] sm:$0xff]  ;;  %v2349_v36 = vpack.c.bf16 %v724_v28, %v723_v27 }
  0xb5   : > { %v822_v35 = vld [vmem:[#allocation6 + $0x388] sm:$0xff]  ;;  %v2381_v37 = vpack.c.bf16 %v756_v31, %v755_v29  ;;  %v2383_v38 = vpack.c.bf16 %v790_v33, %v789_v32  ;;  %v773_v39 = vld [vmem:[#allocation6 + $0x200] sm:$0xff]  ;;  %v791_v44 = vld [vmem:[#allocation6 + $0x290] sm:$0xff] }
  0xb6   : > { %2342 = vmatpush3.bf16.msra.mxu0 %v2341_v10  ;;  %v774_v40 = vld [vmem:[#allocation6 + $0x208] sm:$0xff]  ;;  %v2415_v41 = vpack.c.bf16 %v822_v35, %v821_v34  ;;  %v805_v42 = vld [vmem:[#allocation6 + $0x300] sm:$0xff]  ;;  %v792_v45 = vld [vmem:[#allocation6 + $0x298] sm:$0xff] }
  0xb7   : > { %2374 = vmatpush3.bf16.msra.mxu1 %v2373_v13  ;;  %2344 = vmatprep.subr.bf16.mxu0 %v2343_v14  ;;  %v806_v43 = vld [vmem:[#allocation6 + $0x308] sm:$0xff]  ;;  %v275_v46 = vld [vmem:[%s3102_s2] sm:$0xff]  ;;  %v2385_v47 = vpack.c.bf16 %v774_v40, %v773_v39  ;;  %v824_v49 = vld [vmem:[#allocation6 + $0x398] sm:$0xff]  ;;  %v2387_v54 = vpack.c.bf16 %v792_v45, %v791_v44 }
  0xb8   : > { %2376 = vmatprep.subr.bf16.mxu1 %v2375_v18  ;;  %v823_v48 = vld [vmem:[#allocation6 + $0x390] sm:$0xff]  ;;  %v2417_v51 = vpack.c.bf16 %v806_v43, %v805_v42  ;;  %v776_v56 = vld [vmem:[#allocation6 + $0x218] sm:$0xff]  ;;  %v793_v60 = vld [vmem:[#allocation6 + $0x2a0] sm:$0xff] }
  0xb9   : > { %v339_v50 = vld [vmem:[%s3102_s2 + $0x2] sm:$0xff]  ;;  %v2419_v58 = vpack.c.bf16 %v824_v49, %v823_v48  ;;  %v340_v1 = vld [vmem:[%s3102_s2 + $0xa] sm:$0xff]  ;;  %v3139_v16 = vld [vmem:[%s3102_s2 + $0x1a] sm:$0xff] }
  0xba   : > { %2346 = vmatpush3.bf16.msra.mxu0 %v2345_v24  ;;  %v3125_v53 = vld [vmem:[%s3102_s2 + $0x20] sm:$0xff]  ;;  %v808_v59 = vld [vmem:[#allocation6 + $0x318] sm:$0xff]  ;;  %v794_v61 = vld [vmem:[#allocation6 + $0x2a8] sm:$0xff] }
  0xbb   : > { %2378 = vmatpush3.bf16.msra.mxu1 %v2377_v25  ;;  %2348 = vmatprep.subr.bf16.mxu0 %v2347_v26  ;;  %v775_v55 = vld [vmem:[#allocation6 + $0x210] sm:$0xff]  ;;  %v276_v62 = vld [vmem:[%s3102_s2 + $0x8] sm:$0xff]  ;;  %v825_v63 = vld [vmem:[#allocation6 + $0x3a0] sm:$0xff]  ;;  %v2391_v6 = vpack.c.bf16 %v794_v61, %v793_v60 }
  0xbc   : > { %2380 = vmatprep.subr.bf16.mxu1 %v2379_v30  ;;  %v807_v57 = vld [vmem:[#allocation6 + $0x310] sm:$0xff]  ;;  %v826_v0 = vld [vmem:[#allocation6 + $0x3a8] sm:$0xff]  ;;  %v2389_v4 = vpack.c.bf16 %v776_v56, %v775_v55  ;;  %v777_v7 = vld [vmem:[#allocation6 + $0x220] sm:$0xff] }
  0xbd   : > { %v3133_v3 = vld [vmem:[%s3102_s2 + $0x30] sm:$0xff]  ;;  %v2421_v5 = vpack.c.bf16 %v808_v59, %v807_v57  ;;  %v778_v8 = vld [vmem:[#allocation6 + $0x228] sm:$0xff]  ;;  %v2423_v10 = vpack.c.bf16 %v826_v0, %v825_v63  ;;  %v796_v13 = vld [vmem:[#allocation6 + $0x2b8] sm:$0xff] }
  0xbe   : > { %2350 = vmatpush3.bf16.msra.mxu0 %v2349_v36  ;;  %v809_v9 = vld [vmem:[#allocation6 + $0x320] sm:$0xff]  ;;  %v810_v11 = vld [vmem:[#allocation6 + $0x328] sm:$0xff]  ;;  %v795_v12 = vld [vmem:[#allocation6 + $0x2b0] sm:$0xff]  ;;  %v2393_v20 = vpack.c.bf16 %v778_v8, %v777_v7 }
  0xbf   : > { %2382 = vmatpush3.bf16.msra.mxu1 %v2381_v37  ;;  %2384 = vmatprep.subr.bf16.mxu0 %v2383_v38  ;;  %v827_v14 = vld [vmem:[#allocation6 + $0x3b0] sm:$0xff]  ;;  %v828_v15 = vld [vmem:[#allocation6 + $0x3b8] sm:$0xff]  ;;  %v2425_v21 = vpack.c.bf16 %v810_v11, %v809_v9  ;;  %v2395_v22 = vpack.c.bf16 %v796_v13, %v795_v12  ;;  %v797_v28 = vld [vmem:[#allocation6 + $0x2c0] sm:$0xff] }
  0xc0   : > { %2416 = vmatprep.subr.bf16.mxu1 %v2415_v41  ;;  %v3142_v18 = vld [vmem:[%s3102_s2 + $0x21] sm:$0xff]  ;;  %v3145_v19 = vld [vmem:[%s3102_s2 + $0x38] sm:$0xff]  ;;  %v2427_v26 = vpack.c.bf16 %v828_v15, %v827_v14  ;;  %v3171_v48 = vld [vmem:[%s3102_s2 + $0x50] sm:$0xff] }
  0xc1   : > { %918 = vmatmul.mubr.f32.vlgmr.msra.gmra.mrb[0].mxu0 %v275_v46  ;;  %v779_v23 = vld [vmem:[#allocation6 + $0x230] sm:$0xff]  ;;  %v780_v24 = vld [vmem:[#allocation6 + $0x238] sm:$0xff]  ;;  %v798_v29 = vld [vmem:[#allocation6 + $0x2c8] sm:$0xff] }
  0xc2   : > { %1063 = vmatmul.mubr.f32.vlgmr.msra.gmra.mrb[0].mxu1 %v339_v50  ;;  %2386 = vmatpush3.bf16.msra.mxu0 %v2385_v47  ;;  %v811_v25 = vld [vmem:[#allocation6 + $0x330] sm:$0xff]  ;;  %v812_v27 = vld [vmem:[#allocation6 + $0x338] sm:$0xff]  ;;  %v829_v30 = vld [vmem:[#allocation6 + $0x3c0] sm:$0xff]  ;;  %v2399_v36 = vpack.c.bf16 %v798_v29, %v797_v28 }
  0xc3   : > { %2418 = vmatpush3.bf16.msra.mxu1 %v2417_v51  ;;  %922 = vmatprep.mubr.f32.mxu0 %v308_v52  ;;  %v830_v31 = vld [vmem:[#allocation6 + $0x3c8] sm:$0xff]  ;;  %v2429_v35 = vpack.c.bf16 %v812_v27, %v811_v25  ;;  %v781_v37 = vld [vmem:[#allocation6 + $0x240] sm:$0xff]  ;;  %v799_v42 = vld [vmem:[#allocation6 + $0x2d0] sm:$0xff] }
  0xc4   : > { %1067 = vmatprep.mubr.f32.mxu1 %v3125_v53  ;;  %2388 = vmatprep.subr.bf16.mxu0 %v2387_v54  ;;  %v3152_v32 = vld [vmem:[%s3102_s2 + $0x22] sm:$0xff]  ;;  %v3155_v33 = vld [vmem:[%s3102_s2 + $0x31] sm:$0xff]  ;;  %v2431_v40 = vpack.c.bf16 %v830_v31, %v829_v30  ;;  %v3168_v47 = vld [vmem:[%s3102_s2 + $0x39] sm:$0xff] }
  0xc5   : > { %923 = vmatmul.mubr.f32.gmra.mrb[2].mxu0 %v276_v62  ;;  %2420 = vmatprep.subr.bf16.mxu1 %v2419_v58  ;;  %v3158_v34 = vld [vmem:[%s3102_s2 + $0x48] sm:$0xff]  ;;  %v813_v39 = vld [vmem:[#allocation6 + $0x340] sm:$0xff]  ;;  %v831_v44 = vld [vmem:[#allocation6 + $0x3d0] sm:$0xff] }
  0xc6   : > { %1068 = vmatmul.mubr.f32.gmra.mrb[2].mxu1 %v340_v1  ;;  %927 = vmatprep.mubr.f32.mxu0 %v3130_v2  ;;  %v782_v38 = vld [vmem:[#allocation6 + $0x248] sm:$0xff]  ;;  %v800_v43 = vld [vmem:[#allocation6 + $0x2d8] sm:$0xff]  ;;  %v783_v52 = vld [vmem:[#allocation6 + $0x250] sm:$0xff] }
  0xc7   : > { %1072 = vmatprep.mubr.f32.mxu1 %v3133_v3  ;;  %2390 = vmatpush3.bf16.msra.mxu0 %v2389_v4  ;;  %v814_v41 = vld [vmem:[#allocation6 + $0x348] sm:$0xff]  ;;  %v832_v45 = vld [vmem:[#allocation6 + $0x3d8] sm:$0xff]  ;;  %v2401_v49 = vpack.c.bf16 %v782_v38, %v781_v37  ;;  %v2403_v51 = vpack.c.bf16 %v800_v43, %v799_v42  ;;  %v815_v54 = vld [vmem:[#allocation6 + $0x350] sm:$0xff] }
  0xc8   : > { %2422 = vmatpush3.bf16.msra.mxu1 %v2421_v5  ;;  %2392 = vmatprep.subr.bf16.mxu0 %v2391_v6  ;;  %v3165_v46 = vld [vmem:[%s3102_s2 + $0x32] sm:$0xff]  ;;  %v2433_v50 = vpack.c.bf16 %v814_v41, %v813_v39  ;;  %v2435_v55 = vpack.c.bf16 %v832_v45, %v831_v44  ;;  %v3178_v61 = vld [vmem:[%s3102_s2 + $0x3a] sm:$0xff]  ;;  %v3181_v62 = vld [vmem:[%s3102_s2 + $0x49] sm:$0xff] }
  0xc9   : > { %928 = vmatmul.mubr.f32.gmra.mrb[4].mxu0 %v3118_v17  ;;  %2424 = vmatprep.subr.bf16.mxu1 %v2423_v10  ;;  %v2397_v17 = vpack.c.bf16 %v780_v24, %v779_v23  ;;  %v816_v56 = vld [vmem:[#allocation6 + $0x358] sm:$0xff]  ;;  %v801_v57 = vld [vmem:[#allocation6 + $0x2e0] sm:$0xff]  ;;  %v802_v58 = vld [vmem:[#allocation6 + $0x2e8] sm:$0xff] }
  0xca   : > { %1073 = vmatmul.mubr.f32.gmra.mrb[4].mxu1 %v3139_v16  ;;  %932 = vmatprep.mubr.f32.mxu0 %v3142_v18  ;;  %v833_v59 = vld [vmem:[#allocation6 + $0x3e0] sm:$0xff]  ;;  %v834_v60 = vld [vmem:[#allocation6 + $0x3e8] sm:$0xff]  ;;  %v2437_v1 = vpack.c.bf16 %v816_v56, %v815_v54  ;;  %v2407_v4 = vpack.c.bf16 %v802_v58, %v801_v57  ;;  %v803_v10 = vld [vmem:[#allocation6 + $0x2f0] sm:$0xff] }
  0xcb   : > { %1077 = vmatprep.mubr.f32.mxu1 %v3145_v19  ;;  %2394 = vmatpush3.bf16.msra.mxu0 %v2393_v20  ;;  %v3184_v0 = vld [vmem:[%s3102_s2 + $0x60] sm:$0xff]  ;;  %v786_v6 = vld [vmem:[#allocation6 + $0x268] sm:$0xff]  ;;  %v2439_v7 = vpack.c.bf16 %v834_v60, %v833_v59  ;;  %v804_v11 = vld [vmem:[#allocation6 + $0x2f8] sm:$0xff] }
  0xcc   : > { %2426 = vmatpush3.bf16.msra.mxu1 %v2425_v21  ;;  %2396 = vmatprep.subr.bf16.mxu0 %v2395_v22  ;;  %v785_v5 = vld [vmem:[#allocation6 + $0x260] sm:$0xff]  ;;  %v818_v9 = vld [vmem:[#allocation6 + $0x368] sm:$0xff]  ;;  %v835_v12 = vld [vmem:[#allocation6 + $0x3f0] sm:$0xff]  ;;  %v2411_v23 = vpack.c.bf16 %v804_v11, %v803_v10 }
  0xcd   : > { %933 = vmatmul.mubr.f32.gmra.mrb[6].mxu0 %v3125_v53  ;;  %2428 = vmatprep.subr.bf16.mxu1 %v2427_v26  ;;  %v784_v53 = vld [vmem:[#allocation6 + $0x258] sm:$0xff]  ;;  %v817_v8 = vld [vmem:[#allocation6 + $0x360] sm:$0xff]  ;;  %v2409_v21 = vpack.c.bf16 %v786_v6, %v785_v5  ;;  %v787_v24 = vld [vmem:[#allocation6 + $0x270] sm:$0xff] }
  0xce   : > { %1078 = vmatmul.mubr.f32.gmra.mrb[6].mxu1 %v3152_v32  ;;  %937 = vmatprep.mubr.f32.mxu0 %v3155_v33  ;;  %v2405_v63 = vpack.c.bf16 %v784_v53, %v783_v52  ;;  %v836_v13 = vld [vmem:[#allocation6 + $0x3f8] sm:$0xff]  ;;  %v2441_v22 = vpack.c.bf16 %v818_v9, %v817_v8  ;;  %v819_v26 = vld [vmem:[#allocation6 + $0x370] sm:$0xff]  ;;  %v837_v29 = vld [vmem:[#allocation6 + $0x400] sm:$0xff] }
  0xcf   : > { %1082 = vmatprep.mubr.f32.mxu1 %v3158_v34  ;;  %2398 = vmatpush3.bf16.msra.mxu0 %v2397_v17  ;;  %v3191_v14 = vld [vmem:[%s3102_s2 + $0x4a] sm:$0xff]  ;;  %v2443_v27 = vpack.c.bf16 %v836_v13, %v835_v12  ;;  %v3204_v31 = vld [vmem:[%s3102_s2 + $0x52] sm:$0xff]  ;;  %v3207_v17 = vld [vmem:[%s3102_s2 + $0x61] sm:$0xff] }
  0xd0   : > { %2430 = vmatpush3.bf16.msra.mxu1 %v2429_v35  ;;  %2400 = vmatprep.subr.bf16.mxu0 %v2399_v36  ;;  %v3194_v15 = vld [vmem:[%s3102_s2 + $0x51] sm:$0xff]  ;;  %v3197_v20 = vld [vmem:[%s3102_s2 + $0x68] sm:$0xff]  ;;  %v3225_v41 = vld [vmem:[%s3102_s2 + $0x80] sm:$0xff] }
  0xd1   : > { %938 = vmatmul.mubr.f32.gmra.mrb[8].mxu0 %v3133_v3  ;;  %2432 = vmatprep.subr.bf16.mxu1 %v2431_v40  ;;  %v788_v25 = vld [vmem:[#allocation6 + $0x278] sm:$0xff]  ;;  %v838_v30 = vld [vmem:[#allocation6 + $0x408] sm:$0xff]  ;;  %v3240_v44 = vld [vmem:[%s3102_s2 + $0x90] sm:$0xff] }
  0xd2   : > { %1083 = vmatmul.mubr.f32.gmra.mrb[8].mxu1 %v3165_v46  ;;  %942 = vmatprep.mubr.f32.mxu0 %v3168_v47  ;;  %v820_v28 = vld [vmem:[#allocation6 + $0x378] sm:$0xff]  ;;  %v2413_v35 = vpack.c.bf16 %v788_v25, %v787_v24  ;;  %v3212_v38 = vpack.c.bf16 %v838_v30, %v837_v29  ;;  %v3279_v56 = vld [vmem:[%s3102_s2 + $0xb0] sm:$0xff]  ;;  %v3292_v59 = vld [vmem:[%s3102_s2 + $0xc0] sm:$0xff] }
  0xd3   : > { %1087 = vmatprep.mubr.f32.mxu1 %v3171_v48  ;;  %2402 = vmatpush3.bf16.msra.mxu0 %v2401_v49  ;;  %v3210_v36 = vld [vmem:[%s3102_s2 + $0x78] sm:$0xff]  ;;  %v2445_v37 = vpack.c.bf16 %v820_v28, %v819_v26  ;;  %v3219_v39 = vld [vmem:[%s3102_s2 + $0x62] sm:$0xff]  ;;  %v3234_v42 = vld [vmem:[%s3102_s2 + $0x6a] sm:$0xff] }
  0xd4   : > { %2434 = vmatpush3.bf16.msra.mxu1 %v2433_v50  ;;  %2404 = vmatprep.subr.bf16.mxu0 %v2403_v51  ;;  %v3222_v40 = vld [vmem:[%s3102_s2 + $0x69] sm:$0xff]  ;;  %v3237_v43 = vld [vmem:[%s3102_s2 + $0x79] sm:$0xff]  ;;  %v3250_v49 = vld [vmem:[%s3102_s2 + $0x81] sm:$0xff] }
  0xd5   : > { %943 = vmatmul.mubr.f32.gmra.mrb[10].mxu0 %v3145_v19  ;;  %2436 = vmatprep.subr.bf16.mxu1 %v2435_v55  ;;  %v3247_v45 = vld [vmem:[%s3102_s2 + $0x7a] sm:$0xff]  ;;  %v3260_v51 = vld [vmem:[%s3102_s2 + $0x82] sm:$0xff]  ;;  %v3263_v52 = vld [vmem:[%s3102_s2 + $0x91] sm:$0xff] }
  0xd6   : > { %1088 = vmatmul.mubr.f32.gmra.mrb[10].mxu1 %v3178_v61  ;;  %947 = vmatprep.mubr.f32.mxu0 %v3181_v62  ;;  %v3253_v50 = vld [vmem:[%s3102_s2 + $0x98] sm:$0xff]  ;;  %v3266_v53 = vld [vmem:[%s3102_s2 + $0xa8] sm:$0xff]  ;;  %v839_v5 = vld [vmem:[#allocation6 + $0x410] sm:$0xff] }
  0xd7   : > { %1092 = vmatprep.mubr.f32.mxu1 %v3184_v0  ;;  %2406 = vmatpush3.bf16.msra.mxu0 %v2405_v63  ;;  %v3273_v54 = vld [vmem:[%s3102_s2 + $0x92] sm:$0xff]  ;;  %v3286_v57 = vld [vmem:[%s3102_s2 + $0x9a] sm:$0xff]  ;;  %v3289_v58 = vld [vmem:[%s3102_s2 + $0xa9] sm:$0xff] }
  0xd8   : > { %2438 = vmatpush3.bf16.msra.mxu1 %v2437_v1  ;;  %2408 = vmatprep.subr.bf16.mxu0 %v2407_v4  ;;  %v3276_v55 = vld [vmem:[%s3102_s2 + $0x99] sm:$0xff]  ;;  %v3299_v60 = vld [vmem:[%s3102_s2 + $0xaa] sm:$0xff]  ;;  %v1884_v25 = vld [vmem:[%s3102_s2 + $0xe1] sm:$0xff] }
  0xd9   : > { %948 = vmatmul.mubr.f32.gmra.mrb[12].mxu0 %v3158_v34  ;;  %2440 = vmatprep.subr.bf16.mxu1 %v2439_v7  ;;  %v3302_v63 = vld [vmem:[%s3102_s2 + $0xb1] sm:$0xff]  ;;  %v3305_v1 = vld [vmem:[%s3102_s2 + $0xc8] sm:$0xff]  ;;  %v1868_v26 = vld [vmem:[%s3102_s2 + $0xe0] sm:$0xff] }
  0xda   : > { %1093 = vmatmul.mubr.f32.gmra.mrb[12].mxu1 %v3191_v14  ;;  %952 = vmatprep.mubr.f32.mxu0 %v3194_v15  ;;  %v3312_v4 = vld [vmem:[%s3102_s2 + $0xb2] sm:$0xff]  ;;  %v1852_v24 = vld [vmem:[%s3102_s2 + $0xca] sm:$0xff] }
  0xdb   : > { %1097 = vmatprep.mubr.f32.mxu1 %v3197_v20  ;;  %2410 = vmatpush3.bf16.msra.mxu0 %v2409_v21  ;;  %v840_v6 = vld [vmem:[#allocation6 + $0x418] sm:$0xff]  ;;  %v841_v8 = vld [vmem:[#allocation6 + $0x420] sm:$0xff]  ;;  %v842_v9 = vld [vmem:[#allocation6 + $0x428] sm:$0xff] }
  0xdc   : > { %2442 = vmatpush3.bf16.msra.mxu1 %v2441_v22  ;;  %2412 = vmatprep.subr.bf16.mxu0 %v2411_v23  ;;  %v2451_v7 = vpack.c.bf16 %v840_v6, %v839_v5  ;;  %v2455_v10 = vpack.c.bf16 %v842_v9, %v841_v8  ;;  %v844_v11 = vld [vmem:[#allocation6 + $0x438] sm:$0xff]  ;;  %v850_v13 = vld [vmem:[#allocation6 + $0x468] sm:$0xff] }
  0xdd   : > { %953 = vmatmul.mubr.f32.gmra.mrb[14].mxu0 %v3171_v48  ;;  %2444 = vmatprep.subr.bf16.mxu1 %v2443_v27  ;;  %v848_v12 = vld [vmem:[#allocation6 + $0x458] sm:$0xff] }
  0xde   : > { %1098 = vmatmul.mubr.f32.gmra.mrb[14].mxu1 %v3204_v31  ;;  %957 = vmatprep.mubr.f32.mxu0 %v3207_v17  ;;  %v852_v21 = vld [vmem:[#allocation6 + $0x478] sm:$0xff] }
  0xdf   : > { %1102 = vmatprep.mubr.f32.mxu1 %v3210_v36  ;;  %2414 = vmatpush3.bf16.msra.mxu0 %v2413_v35  ;;  %v1883_v22 = vld [vmem:[%s3102_s2 + $0xd9] sm:$0xff] }
  0xe0   : > { %2446 = vmatpush3.bf16.msra.mxu1 %v2445_v37  ;;  %2448 = vmatprep.subr.bf16.mxu0 %v3212_v38  ;;  %v1867_v23 = vld [vmem:[%s3102_s2 + $0xd8] sm:$0xff] }
  0xe1   : > { %958 = vmatmul.mubr.f32.gmra.mrb[16].mxu0 %v3184_v0  ;;  %2479 = vmatprep.subr.bf16.mxu1 %v3212_v38  ;;  %v1899_v27 = vld [vmem:[%s3102_s2 + $0xda] sm:$0xff] }
  0xe2   : > { %1103 = vmatmul.mubr.f32.gmra.mrb[16].mxu1 %v3219_v39  ;;  %962 = vmatprep.mubr.f32.mxu0 %v3222_v40 }
  0xe3   : > { %1107 = vmatprep.mubr.f32.mxu1 %v3225_v41 }
  0xe5   : > { %963 = vmatmul.mubr.f32.gmra.mrb[18].mxu0 %v3197_v20 }
  0xe6   : > { %1108 = vmatmul.mubr.f32.gmra.mrb[18].mxu1 %v3234_v42  ;;  %967 = vmatprep.mubr.f32.mxu0 %v3237_v43 }
  0xe7   : > { %1112 = vmatprep.mubr.f32.mxu1 %v3240_v44 }
  0xe9   : > { %968 = vmatmul.mubr.f32.gmra.mrb[20].mxu0 %v3210_v36 }
  0xea   : > { %1113 = vmatmul.mubr.f32.gmra.mrb[20].mxu1 %v3247_v45  ;;  %972 = vmatprep.mubr.f32.mxu0 %v3250_v49 }
  0xeb   : > { %1117 = vmatprep.mubr.f32.mxu1 %v3253_v50 }
  0xed   : > { %973 = vmatmul.mubr.f32.gmra.mrb[22].mxu0 %v3225_v41 }
  0xee   : > { %1118 = vmatmul.mubr.f32.gmra.mrb[22].mxu1 %v3260_v51  ;;  %977 = vmatprep.mubr.f32.mxu0 %v3263_v52 }
  0xef   : > { %1122 = vmatprep.mubr.f32.mxu1 %v3266_v53 }
  0xf1   : > { %978 = vmatmul.mubr.f32.gmra.mrb[24].mxu0 %v3240_v44 }
  0xf2   : > { %1123 = vmatmul.mubr.f32.gmra.mrb[24].mxu1 %v3273_v54  ;;  %982 = vmatprep.mubr.f32.mxu0 %v3276_v55 }
  0xf3   : > { %1127 = vmatprep.mubr.f32.mxu1 %v3279_v56 }
  0xf5   : > { %983 = vmatmul.mubr.f32.gmra.mrb[26].mxu0 %v3253_v50 }
  0xf6   : > { %1128 = vmatmul.mubr.f32.gmra.mrb[26].mxu1 %v3286_v57  ;;  %987 = vmatprep.mubr.f32.mxu0 %v3289_v58 }
  0xf7   : > { %1132 = vmatprep.mubr.f32.mxu1 %v3292_v59 }
  0xf9   : > { %988 = vmatmul.mubr.f32.gmra.mrb[28].mxu0 %v3266_v53 }
  0xfa   : > { %1133 = vmatmul.mubr.f32.gmra.mrb[28].mxu1 %v3299_v60  ;;  %992 = vmatprep.mubr.f32.mxu0 %v3302_v63 }
  0xfb   : > { %1137 = vmatprep.mubr.f32.mxu1 %v3305_v1 }
  0xfd   : > { %993 = vmatmul.mubr.f32.gmra.mrb[30].mxu0 %v3279_v56 }
  0xfe   : > { %1138 = vmatmul.mubr.f32.gmra.mrb[30].mxu1 %v3312_v4  ;;  %1207 = vmatprep.mubr.f32.mxu0 %v3139_v16  ;;  %v843_v16 = vld [vmem:[#allocation6 + $0x430] sm:$0xff] }
  0xff   : > { %1352 = vmatprep.mubr.f32.mxu1 %v3155_v33 }
 0x101   : > { %1208 = vmatmul.mubr.f32.vlgmr.msra.gmra.mrb[32].mxu0 %v3130_v2  ;;  %v2459_v2 = vpack.c.bf16 %v844_v11, %v843_v16 }
 0x102   : > { %1353 = vmatmul.mubr.f32.vlgmr.msra.gmra.mrb[32].mxu1 %v3133_v3  ;;  %2450 = vmatpush3.bf16.msra.mxu0 %v3212_v38  ;;  %v845_v3 = vld [vmem:[#allocation6 + $0x440] sm:$0xff] }
 0x103   : > { %2487 = vmatpush3.bf16.msra.mxu1 %v3212_v38  ;;  %1212 = vmatprep.mubr.f32.mxu0 %v3152_v32  ;;  %v846_v32 = vld [vmem:[#allocation6 + $0x448] sm:$0xff] }
 0x104   : > { %1357 = vmatprep.mubr.f32.mxu1 %v3168_v47  ;;  %2452 = vmatprep.subr.bf16.mxu0 %v2451_v7 }
 0x105   : > { %1213 = vmatmul.mubr.f32.gmra.mrb[34].mxu0 %v3142_v18  ;;  %2480 = vmatprep.subr.bf16.mxu1 %v2451_v7  ;;  %v2463_v18 = vpack.c.bf16 %v846_v32, %v845_v3 }
 0x106   : > { %1358 = vmatmul.mubr.f32.gmra.mrb[34].mxu1 %v3145_v19  ;;  %1217 = vmatprep.mubr.f32.mxu0 %v3165_v46  ;;  %v847_v19 = vld [vmem:[#allocation6 + $0x450] sm:$0xff] }
 0x107   : > { %1362 = vmatprep.mubr.f32.mxu1 %v3181_v62  ;;  %2454 = vmatpush3.bf16.msra.mxu0 %v2451_v7 }
 0x108   : > { %2488 = vmatpush3.bf16.msra.mxu1 %v2451_v7  ;;  %2456 = vmatprep.subr.bf16.mxu0 %v2455_v10 }
 0x109   : > { %1218 = vmatmul.mubr.f32.gmra.mrb[36].mxu0 %v3155_v33  ;;  %2481 = vmatprep.subr.bf16.mxu1 %v2455_v10  ;;  %v2467_v33 = vpack.c.bf16 %v848_v12, %v847_v19 }
 0x10a   : > { %1363 = vmatmul.mubr.f32.gmra.mrb[36].mxu1 %v3158_v34  ;;  %1222 = vmatprep.mubr.f32.mxu0 %v3178_v61  ;;  %v849_v34 = vld [vmem:[#allocation6 + $0x460] sm:$0xff] }
 0x10b   : > { %1367 = vmatprep.mubr.f32.mxu1 %v3194_v15  ;;  %2458 = vmatpush3.bf16.msra.mxu0 %v2455_v10 }
 0x10c   : > { %2489 = vmatpush3.bf16.msra.mxu1 %v2455_v10  ;;  %2460 = vmatprep.subr.bf16.mxu0 %v2459_v2 }
 0x10d   : > { %1223 = vmatmul.mubr.f32.gmra.mrb[38].mxu0 %v3168_v47  ;;  %2482 = vmatprep.subr.bf16.mxu1 %v2459_v2  ;;  %v2471_v47 = vpack.c.bf16 %v850_v13, %v849_v34 }
 0x10e   : > { %1368 = vmatmul.mubr.f32.gmra.mrb[38].mxu1 %v3171_v48  ;;  %1227 = vmatprep.mubr.f32.mxu0 %v3191_v14  ;;  %v851_v48 = vld [vmem:[#allocation6 + $0x470] sm:$0xff] }
 0x10f   : > { %1372 = vmatprep.mubr.f32.mxu1 %v3207_v17  ;;  %2462 = vmatpush3.bf16.msra.mxu0 %v2459_v2 }
 0x110   : > { %2490 = vmatpush3.bf16.msra.mxu1 %v2459_v2  ;;  %2464 = vmatprep.subr.bf16.mxu0 %v2463_v18 }
 0x111   : > { %1228 = vmatmul.mubr.f32.gmra.mrb[40].mxu0 %v3181_v62  ;;  %2483 = vmatprep.subr.bf16.mxu1 %v2463_v18  ;;  %v2475_v62 = vpack.c.bf16 %v852_v21, %v851_v48 }
 0x112   : > { %1373 = vmatmul.mubr.f32.gmra.mrb[40].mxu1 %v3184_v0  ;;  %1232 = vmatprep.mubr.f32.mxu0 %v3204_v31  ;;  %v1881_v0 = vld [vmem:[%s3102_s2 + $0xc1] sm:$0xff] }
 0x113   : > { %1377 = vmatprep.mubr.f32.mxu1 %v3222_v40  ;;  %2466 = vmatpush3.bf16.msra.mxu0 %v2463_v18 }
 0x114   : > { %2491 = vmatpush3.bf16.msra.mxu1 %v2463_v18  ;;  %2468 = vmatprep.subr.bf16.mxu0 %v2467_v33 }
 0x115   : > { %1233 = vmatmul.mubr.f32.gmra.mrb[42].mxu0 %v3194_v15  ;;  %2484 = vmatprep.subr.bf16.mxu1 %v2467_v33  ;;  %v1882_v15 = vld [vmem:[%s3102_s2 + $0xc9] sm:$0xff] }
 0x116   : > { %1378 = vmatmul.mubr.f32.gmra.mrb[42].mxu1 %v3197_v20  ;;  %1237 = vmatprep.mubr.f32.mxu0 %v3219_v39  ;;  %v1851_v20 = vld [vmem:[%s3102_s2 + $0xc2] sm:$0xff] }
 0x117   : > { %1382 = vmatprep.mubr.f32.mxu1 %v3237_v43  ;;  %2470 = vmatpush3.bf16.msra.mxu0 %v2467_v33 }
 0x118   : > { %2492 = vmatpush3.bf16.msra.mxu1 %v2467_v33  ;;  %2472 = vmatprep.subr.bf16.mxu0 %v2471_v47 }
 0x119   : > { %1238 = vmatmul.mubr.f32.gmra.mrb[44].mxu0 %v3207_v17  ;;  %2485 = vmatprep.subr.bf16.mxu1 %v2471_v47 }
 0x11a   : > { %1383 = vmatmul.mubr.f32.gmra.mrb[44].mxu1 %v3210_v36  ;;  %1242 = vmatprep.mubr.f32.mxu0 %v3234_v42 }
 0x11b   : > { %1387 = vmatprep.mubr.f32.mxu1 %v3250_v49  ;;  %2474 = vmatpush3.bf16.msra.mxu0 %v2471_v47 }
 0x11c   : > { %2493 = vmatpush3.bf16.msra.mxu1 %v2471_v47  ;;  %2476 = vmatprep.subr.bf16.mxu0 %v2475_v62 }
 0x11d   : > { %1243 = vmatmul.mubr.f32.gmra.mrb[46].mxu0 %v3222_v40  ;;  %2486 = vmatprep.subr.bf16.mxu1 %v2475_v62 }
 0x11e   : > { %1388 = vmatmul.mubr.f32.gmra.mrb[46].mxu1 %v3225_v41  ;;  %1247 = vmatprep.mubr.f32.mxu0 %v3247_v45 }
 0x11f   : > { %1392 = vmatprep.mubr.f32.mxu1 %v3263_v52  ;;  %2478 = vmatpush3.bf16.msra.mxu0 %v2475_v62 }
 0x120   : > { %2494 = vmatpush3.bf16.msra.mxu1 %v2475_v62 }
 0x121   : > { %1248 = vmatmul.mubr.f32.gmra.mrb[48].mxu0 %v3237_v43 }
 0x122   : > { %1393 = vmatmul.mubr.f32.gmra.mrb[48].mxu1 %v3240_v44  ;;  %1252 = vmatprep.mubr.f32.mxu0 %v3260_v51 }
 0x123   : > { %1397 = vmatprep.mubr.f32.mxu1 %v3276_v55 }
 0x125   : > { %1253 = vmatmul.mubr.f32.gmra.mrb[50].mxu0 %v3250_v49 }
 0x126   : > { %1398 = vmatmul.mubr.f32.gmra.mrb[50].mxu1 %v3253_v50  ;;  %1257 = vmatprep.mubr.f32.mxu0 %v3273_v54 }
 0x127   : > { %1402 = vmatprep.mubr.f32.mxu1 %v3289_v58 }
 0x129   : > { %1258 = vmatmul.mubr.f32.gmra.mrb[52].mxu0 %v3263_v52 }
 0x12a   : > { %1403 = vmatmul.mubr.f32.gmra.mrb[52].mxu1 %v3266_v53  ;;  %1262 = vmatprep.mubr.f32.mxu0 %v3286_v57 }
 0x12b   : > { %1407 = vmatprep.mubr.f32.mxu1 %v3302_v63 }
 0x12d   : > { %1263 = vmatmul.mubr.f32.gmra.mrb[54].mxu0 %v3276_v55 }
 0x12e   : > { %1408 = vmatmul.mubr.f32.gmra.mrb[54].mxu1 %v3279_v56  ;;  %1267 = vmatprep.mubr.f32.mxu0 %v3299_v60 }
 0x12f   : > { %1412 = vmatprep.mubr.f32.mxu1 %v1881_v0 }
 0x131   : > { %1268 = vmatmul.mubr.f32.gmra.mrb[56].mxu0 %v3289_v58 }
 0x132   : > { %1413 = vmatmul.mubr.f32.gmra.mrb[56].mxu1 %v3292_v59  ;;  %1272 = vmatprep.mubr.f32.mxu0 %v3312_v4 }
 0x133   : > { %1417 = vmatprep.mubr.f32.mxu1 %v1882_v15 }
 0x135   : > { %1273 = vmatmul.mubr.f32.gmra.mrb[58].mxu0 %v3302_v63 }
 0x136   : > { %1418 = vmatmul.mubr.f32.gmra.mrb[58].mxu1 %v3305_v1  ;;  %1277 = vmatprep.mubr.f32.mxu0 %v1851_v20 }
 0x137   : > { %1422 = vmatprep.mubr.f32.mxu1 %v1883_v22 }
 0x139   : > { %1278 = vmatmul.mubr.f32.gmra.mrb[60].mxu0 %v1881_v0 }
 0x13a   : > { %1423 = vmatmul.mubr.f32.gmra.mrb[60].mxu1 %v1867_v23  ;;  %1282 = vmatprep.mubr.f32.mxu0 %v1852_v24 }
 0x13b   : > { %1427 = vmatprep.mubr.f32.mxu1 %v1884_v25 }
 0x13d   : > { %1283 = vmatmul.mubr.f32.gmra.mrb[62].mxu0 %v1882_v15 }
 0x13e   : > { %1428 = vmatmul.mubr.f32.gmra.mrb[62].mxu1 %v1868_v26  ;;  %2295 = vmatprep.mubr.f32.mxu0 %v3165_v46  ;;  %v1900_v46 = vld [vmem:[%s3102_s2 + $0xe2] sm:$0xff] }
 0x13f   : > { %2307 = vmatprep.mubr.f32.mxu1 %v3273_v54 }
 0x141   : > { %2296 = vmatmul.mubr.f32.vlgmr.msra.gmra.mrb[64].mxu0 %v3178_v61 }
 0x142   : > { %2308 = vmatmul.mubr.f32.vlgmr.msra.gmra.mrb[64].mxu1 %v3286_v57  ;;  %2298 = vmatprep.mubr.f32.mxu0 %v3191_v14 }
 0x143   : > { %2310 = vmatprep.mubr.f32.mxu1 %v3299_v60 }
 0x145   : > { %2299 = vmatmul.mubr.f32.gmra.mrb[66].mxu0 %v3204_v31 }
 0x146   : > { %2311 = vmatmul.mubr.f32.gmra.mrb[66].mxu1 %v3312_v4  ;;  %2301 = vmatprep.mubr.f32.mxu0 %v3219_v39 }
 0x147   : > { %2313 = vmatprep.mubr.f32.mxu1 %v1851_v20 }
 0x149   : > { %2302 = vmatmul.mubr.f32.gmra.mrb[68].mxu0 %v3234_v42 }
 0x14a   : > { %2314 = vmatmul.mubr.f32.gmra.mrb[68].mxu1 %v1852_v24  ;;  %2304 = vmatprep.mubr.f32.mxu0 %v3247_v45 }
 0x14b   : > { %2316 = vmatprep.mubr.f32.mxu1 %v1899_v27 }
 0x14d   : > { %2305 = vmatmul.mubr.f32.gmra.mrb[70].mxu0 %v3260_v51 }
 0x14e   : > { %2317 = vmatmul.mubr.f32.gmra.mrb[70].mxu1 %v1900_v46 }
 0x194   : > { %v1943_v61 = vpop.f32.mrb[0].mxu0 }
 0x195   : > { %v2023_v14 = vpop.f32.mrb[0].mxu1  ;;  %v1944_v28 = vpop.f32.mrb[1].mxu0 }
 0x196   : > { %v1945_v29 = vadd.f32 %v1944_v28, %v1943_v61  ;;  %v2024_v30 = vpop.f32.mrb[1].mxu1 }
 0x197   : > { %v2025_v31 = vadd.f32 %v2024_v30, %v2023_v14 }
 0x198   : > { %v1946_v17 = vpop.f32.mrb[2].mxu0 }
 0x199   : > { %v3394_v35 = vadd.f32 %v2025_v31, %v1945_v29  ;;  %v2026_v36 = vpop.f32.mrb[2].mxu1  ;;  %v1947_v37 = vpop.f32.mrb[3].mxu0 }
 0x19a   : > { %v1948_v38 = vadd.f32 %v1947_v37, %v1946_v17  ;;  %v2027_v39 = vpop.f32.mrb[3].mxu1 }
 0x19b   : > { %v2028_v40 = vadd.f32 %v2027_v39, %v2026_v36 }
 0x19c   : > { %v1949_v41 = vpop.f32.mrb[4].mxu0 }
 0x19d   : > { %v3396_v42 = vadd.f32 %v2028_v40, %v1948_v38  ;;  %v2029_v43 = vpop.f32.mrb[4].mxu1  ;;  %v1950_v44 = vpop.f32.mrb[5].mxu0 }
 0x19e   : > { %v1951_v45 = vadd.f32 %v1950_v44, %v1949_v41  ;;  %v2030_v49 = vpop.f32.mrb[5].mxu1 }
 0x19f   : > { %v2031_v50 = vadd.f32 %v2030_v49, %v2029_v43 }
 0x1a0   : > { %v1952_v51 = vpop.f32.mrb[6].mxu0 }
 0x1a1   : > { %v3398_v52 = vadd.f32 %v2031_v50, %v1951_v45  ;;  %v2032_v53 = vpop.f32.mrb[6].mxu1  ;;  %v1953_v54 = vpop.f32.mrb[7].mxu0 }
 0x1a2   : > { %v1954_v55 = vadd.f32 %v1953_v54, %v1952_v51  ;;  %v2033_v56 = vpop.f32.mrb[7].mxu1 }
 0x1a3   : > { %v2034_v57 = vadd.f32 %v2033_v56, %v2032_v53 }
 0x1a4   : > { %v1955_v58 = vpop.f32.mrb[8].mxu0 }
 0x1a5   : > { %v3400_v59 = vadd.f32 %v2034_v57, %v1954_v55  ;;  %v2035_v60 = vpop.f32.mrb[8].mxu1  ;;  %v1956_v63 = vpop.f32.mrb[9].mxu0 }
 0x1a6   : > { %v1957_v1 = vadd.f32 %v1956_v63, %v1955_v58  ;;  %v2036_v4 = vpop.f32.mrb[9].mxu1 }
 0x1a7   : > { %v2037_v5 = vadd.f32 %v2036_v4, %v2035_v60 }
 0x1a8   : > { %v1958_v6 = vpop.f32.mrb[10].mxu0 }
 0x1a9   : > { %v3402_v7 = vadd.f32 %v2037_v5, %v1957_v1  ;;  %v2038_v8 = vpop.f32.mrb[10].mxu1  ;;  %v1959_v9 = vpop.f32.mrb[11].mxu0 }
 0x1aa   : > { %v1960_v10 = vadd.f32 %v1959_v9, %v1958_v6  ;;  %v2039_v16 = vpop.f32.mrb[11].mxu1 }
 0x1ab   : > { %v2040_v11 = vadd.f32 %v2039_v16, %v2038_v8 }
 0x1ac   : > { %v1961_v2 = vpop.f32.mrb[12].mxu0 }
 0x1ad   : > { %v3404_v3 = vadd.f32 %v2040_v11, %v1960_v10  ;;  %v2041_v32 = vpop.f32.mrb[12].mxu1  ;;  %v1962_v18 = vpop.f32.mrb[13].mxu0 }
 0x1ae   : > { %v1963_v19 = vadd.f32 %v1962_v18, %v1961_v2  ;;  %v2042_v12 = vpop.f32.mrb[13].mxu1 }
 0x1af   : > { %v2043_v33 = vadd.f32 %v2042_v12, %v2041_v32 }
 0x1b0   : > { %v1964_v34 = vpop.f32.mrb[14].mxu0 }
 0x1b1   : > { %v3406_v13 = vadd.f32 %v2043_v33, %v1963_v19  ;;  %v2044_v47 = vpop.f32.mrb[14].mxu1  ;;  %v1965_v48 = vpop.f32.mrb[15].mxu0 }
 0x1b2   : > { %v1966_v21 = vadd.f32 %v1965_v48, %v1964_v34  ;;  %v2045_v62 = vpop.f32.mrb[15].mxu1 }
 0x1b3   : > { %v2046_v0 = vadd.f32 %v2045_v62, %v2044_v47 }
 0x1b4   : > { %v1967_v15 = vpop.f32.mrb[16].mxu0 }
 0x1b5   : > { %v3408_v20 = vadd.f32 %v2046_v0, %v1966_v21  ;;  %v2047_v22 = vpop.f32.mrb[16].mxu1  ;;  %v1968_v23 = vpop.f32.mrb[17].mxu0 }
 0x1b6   : > { %v1969_v24 = vadd.f32 %v1968_v23, %v1967_v15  ;;  %v2048_v25 = vpop.f32.mrb[17].mxu1 }
 0x1b7   : > { %v2049_v26 = vadd.f32 %v2048_v25, %v2047_v22 }
 0x1b8   : > { %v1970_v27 = vpop.f32.mrb[18].mxu0 }
 0x1b9   : > { %v3410_v46 = vadd.f32 %v2049_v26, %v1969_v24  ;;  %v2050_v61 = vpop.f32.mrb[18].mxu1  ;;  %v1971_v14 = vpop.f32.mrb[19].mxu0 }
 0x1ba   : > { %v1972_v28 = vadd.f32 %v1971_v14, %v1970_v27  ;;  %v2051_v29 = vpop.f32.mrb[19].mxu1 }
 0x1bb   : > { %v2052_v30 = vadd.f32 %v2051_v29, %v2050_v61 }
 0x1bc   : > { %v1973_v31 = vpop.f32.mrb[20].mxu0 }
 0x1bd   : > { %v3412_v17 = vadd.f32 %v2052_v30, %v1972_v28  ;;  %v2053_v36 = vpop.f32.mrb[20].mxu1  ;;  %v1974_v37 = vpop.f32.mrb[21].mxu0 }
 0x1be   : > { %v1975_v38 = vadd.f32 %v1974_v37, %v1973_v31  ;;  %v2054_v39 = vpop.f32.mrb[21].mxu1 }
 0x1bf   : > { %v2055_v40 = vadd.f32 %v2054_v39, %v2053_v36 }
 0x1c0   : > { %v1976_v41 = vpop.f32.mrb[22].mxu0 }
 0x1c1   : > { %v3414_v43 = vadd.f32 %v2055_v40, %v1975_v38  ;;  %v2056_v44 = vpop.f32.mrb[22].mxu1  ;;  %v1977_v45 = vpop.f32.mrb[23].mxu0 }
 0x1c2   : > { %v1978_v49 = vadd.f32 %v1977_v45, %v1976_v41  ;;  %v2057_v50 = vpop.f32.mrb[23].mxu1 }
 0x1c3   : > { %v2058_v51 = vadd.f32 %v2057_v50, %v2056_v44 }
 0x1c4   : > { %v1979_v53 = vpop.f32.mrb[24].mxu0 }
 0x1c5   : > { %v3416_v54 = vadd.f32 %v2058_v51, %v1978_v49  ;;  %v2059_v55 = vpop.f32.mrb[24].mxu1  ;;  %v1980_v56 = vpop.f32.mrb[25].mxu0 }
 0x1c6   : > { %v1981_v57 = vadd.f32 %v1980_v56, %v1979_v53  ;;  %v2060_v58 = vpop.f32.mrb[25].mxu1 }
 0x1c7   : > { %v2061_v60 = vadd.f32 %v2060_v58, %v2059_v55 }
 0x1c8   : > { %v1982_v63 = vpop.f32.mrb[26].mxu0 }
 0x1c9   : > { %v3418_v1 = vadd.f32 %v2061_v60, %v1981_v57  ;;  %v2062_v4 = vpop.f32.mrb[26].mxu1  ;;  %v1983_v5 = vpop.f32.mrb[27].mxu0 }
 0x1ca   : > { %v1984_v6 = vadd.f32 %v1983_v5, %v1982_v63  ;;  %v2063_v8 = vpop.f32.mrb[27].mxu1 }
 0x1cb   : > { %v2064_v9 = vadd.f32 %v2063_v8, %v2062_v4 }
 0x1cc   : > { %v1985_v10 = vpop.f32.mrb[28].mxu0 }
 0x1cd   : > { %v3420_v16 = vadd.f32 %v2064_v9, %v1984_v6  ;;  %v2065_v11 = vpop.f32.mrb[28].mxu1  ;;  %v1986_v2 = vpop.f32.mrb[29].mxu0 }
 0x1ce   : > { %v1987_v32 = vadd.f32 %v1986_v2, %v1985_v10  ;;  %v2066_v18 = vpop.f32.mrb[29].mxu1 }
 0x1cf   : > { %v2067_v19 = vadd.f32 %v2066_v18, %v2065_v11 }
 0x1d0   : > { %v1988_v12 = vpop.f32.mrb[30].mxu0 }
 0x1d1   : > { %v3422_v33 = vadd.f32 %v2067_v19, %v1987_v32  ;;  %v2068_v34 = vpop.f32.mrb[30].mxu1  ;;  %v1989_v47 = vpop.f32.mrb[31].mxu0 }
 0x1d2   : > { %v1990_v48 = vadd.f32 %v1989_v47, %v1988_v12  ;;  %v2069_v21 = vpop.f32.mrb[31].mxu1 }
 0x1d3   : > { %v2070_v62 = vadd.f32 %v2069_v21, %v2068_v34 }
 0x1d4   : > { %v2103_v0 = vpop.f32.mrb[32].mxu0 }
 0x1d5   : > { %v3424_v15 = vadd.f32 %v2070_v62, %v1990_v48  ;;  %v2183_v22 = vpop.f32.mrb[32].mxu1  ;;  %v2104_v23 = vpop.f32.mrb[33].mxu0 }
 0x1d6   : > { %v2105_v24 = vadd.f32 %v2104_v23, %v2103_v0  ;;  %v2184_v25 = vpop.f32.mrb[33].mxu1 }
 0x1d7   : > { %v2185_v26 = vadd.f32 %v2184_v25, %v2183_v22 }
 0x1d8   : > { %v1210_v27 = vadd.f32 %v2105_v24, %v3394_v35  ;;  %v2106_v61 = vpop.f32.mrb[34].mxu0 }
 0x1d9   : > { %v2186_v14 = vpop.f32.mrb[34].mxu1  ;;  %v2107_v28 = vpop.f32.mrb[35].mxu0 }
 0x1da   : > { %v2108_v29 = vadd.f32 %v2107_v28, %v2106_v61  ;;  %v2187_v30 = vpop.f32.mrb[35].mxu1  ;;  %v3427_v31 = vadd.f32 %v2185_v26, %v1210_v27 }
 0x1db   : > { %v2188_v36 = vadd.f32 %v2187_v30, %v2186_v14 }
 0x1dc   : > { %v1215_v37 = vadd.f32 %v2108_v29, %v3396_v42  ;;  %v2109_v38 = vpop.f32.mrb[36].mxu0 }
 0x1dd   : > { %v2189_v39 = vpop.f32.mrb[36].mxu1  ;;  %v2110_v40 = vpop.f32.mrb[37].mxu0 }
 0x1de   : > { %v2111_v41 = vadd.f32 %v2110_v40, %v2109_v38  ;;  %v2190_v44 = vpop.f32.mrb[37].mxu1  ;;  %v3430_v45 = vadd.f32 %v2188_v36, %v1215_v37 }
 0x1df   : > { %v2191_v49 = vadd.f32 %v2190_v44, %v2189_v39 }
 0x1e0   : > { %v1220_v35 = vadd.f32 %v2111_v41, %v3398_v52  ;;  %v2112_v50 = vpop.f32.mrb[38].mxu0 }
 0x1e1   : > { %v2192_v51 = vpop.f32.mrb[38].mxu1  ;;  %v2113_v53 = vpop.f32.mrb[39].mxu0 }
 0x1e2   : > { %v2114_v55 = vadd.f32 %v2113_v53, %v2112_v50  ;;  %v2193_v56 = vpop.f32.mrb[39].mxu1  ;;  %v3433_v57 = vadd.f32 %v2191_v49, %v1220_v35 }
 0x1e3   : > { %v2194_v58 = vadd.f32 %v2193_v56, %v2192_v51 }
 0x1e4   : > { %v1225_v42 = vadd.f32 %v2114_v55, %v3400_v59  ;;  %v2115_v60 = vpop.f32.mrb[40].mxu0 }
 0x1e5   : > { %v2195_v63 = vpop.f32.mrb[40].mxu1  ;;  %v2116_v4 = vpop.f32.mrb[41].mxu0 }
 0x1e6   : > { %v2117_v5 = vadd.f32 %v2116_v4, %v2115_v60  ;;  %v2196_v6 = vpop.f32.mrb[41].mxu1  ;;  %v3436_v8 = vadd.f32 %v2194_v58, %v1225_v42 }
 0x1e7   : > { %v2197_v9 = vadd.f32 %v2196_v6, %v2195_v63 }
 0x1e8   : > { %v1230_v52 = vadd.f32 %v2117_v5, %v3402_v7  ;;  %v2118_v10 = vpop.f32.mrb[42].mxu0 }
 0x1e9   : > { %v2198_v11 = vpop.f32.mrb[42].mxu1  ;;  %v2119_v2 = vpop.f32.mrb[43].mxu0 }
 0x1ea   : > { %v2120_v32 = vadd.f32 %v2119_v2, %v2118_v10  ;;  %v2199_v18 = vpop.f32.mrb[43].mxu1  ;;  %v3439_v19 = vadd.f32 %v2197_v9, %v1230_v52 }
 0x1eb   : > { %v2200_v12 = vadd.f32 %v2199_v18, %v2198_v11 }
 0x1ec   : > { %v1235_v59 = vadd.f32 %v2120_v32, %v3404_v3  ;;  %v2121_v34 = vpop.f32.mrb[44].mxu0 }
 0x1ed   : > { %v2201_v47 = vpop.f32.mrb[44].mxu1  ;;  %v2122_v48 = vpop.f32.mrb[45].mxu0 }
 0x1ee   : > { %v2123_v21 = vadd.f32 %v2122_v48, %v2121_v34  ;;  %v2202_v62 = vpop.f32.mrb[45].mxu1  ;;  %v3442_v0 = vadd.f32 %v2200_v12, %v1235_v59 }
 0x1ef   : > { %v2203_v22 = vadd.f32 %v2202_v62, %v2201_v47 }
 0x1f0   : > { %v1240_v7 = vadd.f32 %v2123_v21, %v3406_v13  ;;  %v2124_v23 = vpop.f32.mrb[46].mxu0 }
 0x1f1   : > { %v2204_v24 = vpop.f32.mrb[46].mxu1  ;;  %v2125_v25 = vpop.f32.mrb[47].mxu0 }
 0x1f2   : > { %v2126_v26 = vadd.f32 %v2125_v25, %v2124_v23  ;;  %v2205_v27 = vpop.f32.mrb[47].mxu1  ;;  %v3445_v61 = vadd.f32 %v2203_v22, %v1240_v7 }
 0x1f3   : > { %v2206_v14 = vadd.f32 %v2205_v27, %v2204_v24 }
 0x1f4   : > { %v1245_v3 = vadd.f32 %v2126_v26, %v3408_v20  ;;  %v2127_v28 = vpop.f32.mrb[48].mxu0 }
 0x1f5   : > { %v2207_v29 = vpop.f32.mrb[48].mxu1  ;;  %v2128_v30 = vpop.f32.mrb[49].mxu0 }
 0x1f6   : > { %v2129_v36 = vadd.f32 %v2128_v30, %v2127_v28  ;;  %v2208_v37 = vpop.f32.mrb[49].mxu1  ;;  %v3448_v38 = vadd.f32 %v2206_v14, %v1245_v3 }
 0x1f7   : > { %v2209_v39 = vadd.f32 %v2208_v37, %v2207_v29 }
 0x1f8   : > { %v1250_v13 = vadd.f32 %v2129_v36, %v3410_v46  ;;  %v2130_v40 = vpop.f32.mrb[50].mxu0 }
 0x1f9   : > { %v2210_v41 = vpop.f32.mrb[50].mxu1  ;;  %v2131_v44 = vpop.f32.mrb[51].mxu0 }
 0x1fa   : > { %v2132_v49 = vadd.f32 %v2131_v44, %v2130_v40  ;;  %v2211_v35 = vpop.f32.mrb[51].mxu1  ;;  %v3451_v50 = vadd.f32 %v2209_v39, %v1250_v13 }
 0x1fb   : > { %v2212_v51 = vadd.f32 %v2211_v35, %v2210_v41 }
 0x1fc   : > { %v1255_v20 = vadd.f32 %v2132_v49, %v3412_v17  ;;  %v2133_v53 = vpop.f32.mrb[52].mxu0  ;;  %v3466_v49 = vld [vmem:[#allocation8] ss:$0 sm:$0xff] }
 0x1fd   : > { %v2213_v55 = vpop.f32.mrb[52].mxu1  ;;  %v2134_v56 = vpop.f32.mrb[53].mxu0 }
 0x1fe   : > { %v2135_v58 = vadd.f32 %v2134_v56, %v2133_v53  ;;  %v2214_v42 = vpop.f32.mrb[53].mxu1  ;;  %v1400_v60 = vadd.f32 %v2212_v51, %v1255_v20  ;;  %v3469_v53 = vld [vmem:[#allocation9] ss:$0 sm:$0xff] }
 0x1ff   : > { %v2215_v63 = vadd.f32 %v2214_v42, %v2213_v55 }
 0x200   : > { %v1260_v4 = vadd.f32 %v2135_v58, %v3414_v43  ;;  %v2136_v46 = vpop.f32.mrb[54].mxu0 }
 0x201   : > { %v2216_v5 = vpop.f32.mrb[54].mxu1  ;;  %v2137_v6 = vpop.f32.mrb[55].mxu0 }
 0x202   : > { %v2138_v9 = vadd.f32 %v2137_v6, %v2136_v46  ;;  %v2217_v52 = vpop.f32.mrb[55].mxu1  ;;  %v3455_v10 = vadd.f32 %v2215_v63, %v1260_v4 }
 0x203   : > { %v2218_v11 = vadd.f32 %v2217_v52, %v2216_v5 }
 0x204   : > { %v1265_v2 = vadd.f32 %v2138_v9, %v3416_v54  ;;  %v2139_v17 = vpop.f32.mrb[56].mxu0 }
 0x205   : > { %v2219_v32 = vpop.f32.mrb[56].mxu1  ;;  %v2140_v18 = vpop.f32.mrb[57].mxu0 }
 0x206   : > { %v2141_v12 = vadd.f32 %v2140_v18, %v2139_v17  ;;  %v2220_v59 = vpop.f32.mrb[57].mxu1  ;;  %v1410_v34 = vadd.f32 %v2218_v11, %v1265_v2 }
 0x207   : > { %v2221_v47 = vadd.f32 %v2220_v59, %v2219_v32 }
 0x208   : > { %v1270_v48 = vadd.f32 %v2141_v12, %v3418_v1  ;;  %v2142_v43 = vpop.f32.mrb[58].mxu0 }
 0x209   : > { %v2222_v21 = vpop.f32.mrb[58].mxu1  ;;  %v2143_v62 = vpop.f32.mrb[59].mxu0 }
 0x20a   : > { %v2144_v22 = vadd.f32 %v2143_v62, %v2142_v43  ;;  %v2223_v7 = vpop.f32.mrb[59].mxu1  ;;  %v3459_v23 = vadd.f32 %v2221_v47, %v1270_v48 }
 0x20b   : > { %v2224_v24 = vadd.f32 %v2223_v7, %v2222_v21 }
 0x20c   : > { %v1275_v25 = vadd.f32 %v2144_v22, %v3420_v16  ;;  %v2145_v54 = vpop.f32.mrb[60].mxu0 }
 0x20d   : > { %v2225_v26 = vpop.f32.mrb[60].mxu1  ;;  %v2146_v27 = vpop.f32.mrb[61].mxu0 }
 0x20e   : > { %v2147_v14 = vadd.f32 %v2146_v27, %v2145_v54  ;;  %v2226_v3 = vpop.f32.mrb[61].mxu1  ;;  %v1420_v28 = vadd.f32 %v2224_v24, %v1275_v25 }
 0x20f   : > { %v2227_v29 = vadd.f32 %v2226_v3, %v2225_v26 }
 0x210   : > { %v1280_v30 = vadd.f32 %v2147_v14, %v3422_v33  ;;  %v2148_v1 = vpop.f32.mrb[62].mxu0 }
 0x211   : > { %v2228_v36 = vpop.f32.mrb[62].mxu1  ;;  %v2149_v37 = vpop.f32.mrb[63].mxu0 }
 0x212   : > { %v2150_v39 = vadd.f32 %v2149_v37, %v2148_v1  ;;  %v2229_v13 = vpop.f32.mrb[63].mxu1  ;;  %v3463_v40 = vadd.f32 %v2227_v29, %v1280_v30 }
 0x213   : > { %v2230_v41 = vadd.f32 %v2229_v13, %v2228_v36 }
 0x214   : > { %v1285_v16 = vadd.f32 %v2150_v39, %v3424_v15  ;;  %v2297_v44 = vpop.f32.mrb[64].mxu0 }
 0x215   : > { %v1505_v35 = vadd.f32 %v2297_v44, %v3430_v45  ;;  %v2309_v51 = vpop.f32.mrb[64].mxu1  ;;  %v1499_v20 = vpop.f32.mrb[65].mxu0 }
 0x216   : > { %v1545_v33 = vadd.f32 %v2309_v51, %v1400_v60  ;;  %v1500_v55 = vadd.f32 %v1499_v20, %v3427_v31  ;;  %v1539_v56 = vpop.f32.mrb[65].mxu1  ;;  %v3472_v58 = vadd.f32 %v2230_v41, %v1285_v16 }
 0x217   : > { %v1586_v42 = vmul.f32 %v3466_v49, %v1505_v35  ;;  %v1540_v15 = vadd.f32 %v1539_v56, %v3451_v50 }
 0x218   : > { %v1594_v63 = vmul.f32 %v3466_v49, %v1545_v33  ;;  %v1585_v4 = vmul.f32 %v3466_v49, %v1500_v55  ;;  %v2300_v45 = vpop.f32.mrb[66].mxu0 }
 0x219   : > { %v1609_v46 = vadd.f32 %v3469_v53, %v1586_v42  ;;  %v1593_v5 = vmul.f32 %v3466_v49, %v1540_v15  ;;  %v1515_v60 = vadd.f32 %v2300_v45, %v3436_v8  ;;  %v2312_v31 = vpop.f32.mrb[66].mxu1  ;;  %v1509_v6 = vpop.f32.mrb[67].mxu0 }
 0x21a   : > { %v1617_v9 = vadd.f32 %v3469_v53, %v1594_v63  ;;  %v1608_v52 = vadd.f32 %v3469_v53, %v1585_v4  ;;  %v1555_v11 = vadd.f32 %v2312_v31, %v1410_v34  ;;  %v1510_v50 = vadd.f32 %v1509_v6, %v3433_v57  ;;  %v1549_v2 = vpop.f32.mrb[67].mxu1 }
 0x21b   : > { %v1625_v17 = vmax.f32 %v1609_v46, 0.0  ;;  %v1616_v32 = vadd.f32 %v3469_v53, %v1593_v5  ;;  %v1588_v18 = vmul.f32 %v3466_v49, %v1515_v60  ;;  %v1550_v12 = vadd.f32 %v1549_v2, %v3455_v10 }
 0x21c   : > { %v1633_v59 = vmax.f32 %v1617_v9, 0.0  ;;  %v1624_v47 = vmax.f32 %v1608_v52, 0.0  ;;  %v1596_v8 = vmul.f32 %v3466_v49, %v1555_v11  ;;  %v1587_v48 = vmul.f32 %v3466_v49, %v1510_v50  ;;  %v2303_v43 = vpop.f32.mrb[68].mxu0 }
 0x21d   : > { %1641 = vst [vmem:[%s3490_s27 + $0x8] sm:$0xff] %v1625_v17  ;;  %v1632_v57 = vmax.f32 %v1616_v32, 0.0  ;;  %v1611_v34 = vadd.f32 %v3469_v53, %v1588_v18  ;;  %v1595_v21 = vmul.f32 %v3466_v49, %v1550_v12  ;;  %v1525_v10 = vadd.f32 %v2303_v43, %v3442_v0  ;;  %v2315_v62 = vpop.f32.mrb[68].mxu1  ;;  %v1519_v22 = vpop.f32.mrb[69].mxu0 }
 0x21e   : > { %1649 = vst [vmem:[%s3490_s27 + $0x48] sm:$0xff] %v1633_v59  ;;  %1640 = vst [vmem:[%s3490_s27] sm:$0xff] %v1624_v47  ;;  %v1619_v7 = vadd.f32 %v3469_v53, %v1596_v8  ;;  %v1610_v24 = vadd.f32 %v3469_v53, %v1587_v48  ;;  %v1565_v25 = vadd.f32 %v2315_v62, %v1420_v28  ;;  %v1559_v26 = vpop.f32.mrb[69].mxu1 }
 0x21f   : > { %v1520_v54 = vadd.f32 %v1519_v22, %v3439_v19  ;;  %1648 = vst [vmem:[%s3490_s27 + $0x40] sm:$0xff] %v1632_v57  ;;  %v1627_v27 = vmax.f32 %v1611_v34, 0.0  ;;  %v1618_v14 = vadd.f32 %v3469_v53, %v1595_v21  ;;  %v1590_v0 = vmul.f32 %v3466_v49, %v1525_v10 }
 0x220   : > { %v1560_v3 = vadd.f32 %v1559_v26, %v3459_v23  ;;  %v1635_v29 = vmax.f32 %v1619_v7, 0.0  ;;  %v1626_v30 = vmax.f32 %v1610_v24, 0.0  ;;  %v1598_v1 = vmul.f32 %v3466_v49, %v1565_v25  ;;  %v2306_v19 = vpop.f32.mrb[70].mxu0 }
 0x221   : > { %v1589_v28 = vmul.f32 %v3466_v49, %v1520_v54  ;;  %1643 = vst [vmem:[%s3490_s27 + $0x18] sm:$0xff] %v1627_v27  ;;  %v1634_v36 = vmax.f32 %v1618_v14, 0.0  ;;  %v1613_v37 = vadd.f32 %v3469_v53, %v1590_v0  ;;  %v1535_v13 = vadd.f32 %v2306_v19, %v3448_v38  ;;  %v2318_v23 = vpop.f32.mrb[70].mxu1  ;;  %v1529_v41 = vpop.f32.mrb[71].mxu0 }
 0x222   : > { %v1597_v39 = vmul.f32 %v3466_v49, %v1560_v3  ;;  %1651 = vst [vmem:[%s3490_s27 + $0x58] sm:$0xff] %v1635_v29  ;;  %1642 = vst [vmem:[%s3490_s27 + $0x10] sm:$0xff] %v1626_v30  ;;  %v1621_v16 = vadd.f32 %v3469_v53, %v1598_v1  ;;  %v1575_v35 = vadd.f32 %v2318_v23, %v3472_v58  ;;  %v1569_v20 = vpop.f32.mrb[71].mxu1 }
 0x223   : > { %v1612_v44 = vadd.f32 %v3469_v53, %v1589_v28  ;;  %v1530_v51 = vadd.f32 %v1529_v41, %v3445_v61  ;;  %1650 = vst [vmem:[%s3490_s27 + $0x50] sm:$0xff] %v1634_v36  ;;  %v1629_v38 = vmax.f32 %v1613_v37, 0.0  ;;  %v1592_v55 = vmul.f32 %v3466_v49, %v1535_v13 }
 0x224   : > { %v1620_v33 = vadd.f32 %v3469_v53, %v1597_v39  ;;  %v1570_v56 = vadd.f32 %v1569_v20, %v3463_v40  ;;  %v1637_v42 = vmax.f32 %v1621_v16, 0.0  ;;  %v1600_v58 = vmul.f32 %v3466_v49, %v1575_v35 }
 0x225   : > { %v1628_v15 = vmax.f32 %v1612_v44, 0.0  ;;  %v1591_v61 = vmul.f32 %v3466_v49, %v1530_v51  ;;  %1645 = vst [vmem:[%s3490_s27 + $0x28] sm:$0xff] %v1629_v38  ;;  %v1615_v4 = vadd.f32 %v3469_v53, %v1592_v55 }
 0x226   : > { %v1636_v63 = vmax.f32 %v1620_v33, 0.0  ;;  %v1599_v45 = vmul.f32 %v3466_v49, %v1570_v56  ;;  %1653 = vst [vmem:[%s3490_s27 + $0x68] sm:$0xff] %v1637_v42  ;;  %v1623_v40 = vadd.f32 %v3469_v53, %v1600_v58 }
 0x227   : > { %1644 = vst [vmem:[%s3490_s27 + $0x20] sm:$0xff] %v1628_v15  ;;  %v1614_v46 = vadd.f32 %v3469_v53, %v1591_v61  ;;  %v1631_v5 = vmax.f32 %v1615_v4, 0.0 }
 0x228   : > { %1652 = vst [vmem:[%s3490_s27 + $0x60] sm:$0xff] %v1636_v63  ;;  %v1622_v60 = vadd.f32 %v3469_v53, %v1599_v45  ;;  %v1639_v31 = vmax.f32 %v1623_v40, 0.0 }
 0x229   : > { %v1630_v6 = vmax.f32 %v1614_v46, 0.0  ;;  %1647 = vst [vmem:[%s3490_s27 + $0x38] sm:$0xff] %v1631_v5 }
 0x22a   : > { %v1638_v49 = vmax.f32 %v1622_v60, 0.0  ;;  %1655 = vst [vmem:[%s3490_s27 + $0x78] sm:$0xff] %v1639_v31 }
 0x22b   : > { %1646 = vst [vmem:[%s3490_s27 + $0x30] sm:$0xff] %v1630_v6 }
 0x22c   : > { %1654 = vst [vmem:[%s3490_s27 + $0x70] sm:$0xff] %v1638_v49 }
 0x22d   : > { %2739 = shalt.err (!%p2736_p1)
}
 0x22e   : > { %s2740_s30 = scalar_lea.hbm %s3538_s10, 2048  ;;  %s2744_s25 = scalar_lea.hbm %s3634_s12, 8192 }
 0x22f   : > { %p2741_p2 = scmp.ne.s32.totalorder %s3538_s10, %s2740_s30  ;;  %p2745_p13 = scmp.lt.u32.totalorder %s3538_s10, %s3634_s12 }
 0x230   : > { %p2746_p4 = scmp.lt.u32.totalorder %s2744_s25, %s2740_s30  ;;  %p2748_p6 = scmp.lt.u32.totalorder %s2740_s30, %s3538_s10 }
 0x231   : > { %p2742_p8 = pnand %p2741_p2, %p3038_p3 }
 0x232   : > { %p2747_p9 = por %p2746_p4, %p2745_p13 }
 0x233   : > { %p2743_p12 = pneg %p2742_p8 }
 0x234   : > { %p2749_p0 = por %p2748_p6, %p2747_p9 }
 0x236   : > { %p2750_p10 = pnand %p2749_p0, %p2743_p12 }
 0x238   : > { %2753 = shalt.err (!%p2750_p10)
}
 0x239   : > { %s2841_s11 = smov 128   ;;  %s2842_s18 = smov 8  }
 0x23a   : > { %2513 = dma.vmem_to_hbm [thread:$0]  (%p3038_p3), %s3540_s8, 2048, %s3538_s10, %s1657_s5, %s2841_s11, %s2841_s11, %s2842_s18  }
 0x23b PF: > { %s3635_s19 = sld [smem:[#allocation16_spill]]  ;;  %s3636_s14 = sld [smem:[#allocation17_spill]] }
 0x23c   : > { %p2540_p5 = scmp.ge.s32.totalorder %s2832_s22, 2 }
 0x241   : > { %s1688_s7 = sand.u32 1, %s3635_s19   ;;  %p3637_p7 = scmp.ne.s32.totalorder %s3636_s14, 0 }
 0x242   : > { %s1689_s28 = scalar_lea.sflag [#allocation5], %s1688_s7 }
 0x243   : > { %p2530_p11 = pnand %p2540_p5, %p3637_p7 }
 0x245   : > { %2799 = dma.done.wait (!%p2530_p11), %s1689_s28, 2048  }
 0x246   : > { %2801 = vsyncadd (!%p2530_p11), %s1689_s28, 4294965248  ;;  %s22_s22 = sadd.s32 1, %s2832_s22   ;;  %s3638_s15 = smov %s2808_s16 }
 0x247   : > { %p19_p1 = scmp.ge.s32.totalorder %s22_s22, 6   ;;  %s3639_s16 = smov %s2812_s17 }
 0x248   : > { %s3640_s17 = smov %s3055_s26  ;;  %s3641_s18 = smov %s2824_s20 }
 0x249   : > { %s3642_s19 = smov %s2828_s21  ;;  %s3643_s20 = smov %s3646_s24 }
 0x24a   : > { %s3644_s21 = smov %s3650_s6  ;;  %21 = sbr.rel (!%p19_p1) target bundleno = 13 (0xd), region = 95 }
 0x251   :  { %1694 = vsyncpa [#allocation4], 1 }
 0x252   :  { %1696 = vsyncpa [#allocation4 + $0x1], 1 }
 0x253   :  { %1697 = vsyncpa [#allocation7], 1 }
 0x254   :  { %1698 = vsyncpa [#allocation10], 1 }
 0x255   :  { %1699 = vsyncpa [#allocation5], 1 }
 0x256   :  { %1701 = vsyncpa [#allocation5 + $0x1], 1 }

</bundles_post_ra>
